<compile_context>
chip_gen: v7x
topology: tpu7x:2x2x1
jax: 0.10.0
libtpu: 0.0.40
codegen_flags: <defaults>
</compile_context>

<pallas_src>
import jax
import jax.numpy as jnp
import numpy as np
from jax import lax
from jax.experimental import pallas as pl
from jax.experimental.pallas import tpu as pltpu

# ------------------------- model dimensions -------------------------
VOCAB_SIZE = 50          # TODO(synk): encoder.vocab_size comes from a pickle; synthetic constant here
EMBED_DIM = 32
HIDDEN = 64
DENSE_DIM = 32
NUM_CLASSES = 10         # TODO(synk): len(hashtags) unknown; synthetic constant here

BATCH = 2
SEQ = 8
BP = 8                   # batch padded to the f32 sublane width
LANES = 128

H2 = 2 * HIDDEN          # 128: [fwd | bwd] interleaved per gate
GPACK = 3 * H2           # 384: packed gate width [r | z | n], each 2H wide

# fused input table: rows [0:V] fwd emb@W_ih, [V:2V] bwd emb@W_ih, row 2V = folded bias
TW = 128                 # 2V+1 = 101, padded to a full 128-lane vreg width
BIAS_COL = 2 * VOCAB_SIZE  # 100 — "always hot" column selecting the bias row

# gslab (GPACK-wide) row offsets
ROW_TABLE = 0                          # (TW, 384)   fused embedding/input-projection table
ROW_WHH = TW                           # (2H, 384)   block-diagonal hidden projection
GSLAB_ROWS = ROW_WHH + H2              # 256

# dslab (128-wide) row offsets
DROW_W1 = 0                            # (2H, :D)    dense-1 weight
DROW_W2 = DROW_W1 + H2                 # (D, :128)   dense-2 weight (pad cols zero)
DROW_BHN = DROW_W2 + DENSE_DIM         # (8, 128)    bhh_n, pre-replicated to 8 sublanes
DROW_B1 = DROW_BHN + BP                # (8, :D)     b1, pre-replicated
DROW_B2 = DROW_B1 + BP                 # (8, 128)    b2, pre-replicated, pad lanes = -1e30
DSLAB_ROWS = DROW_B2 + BP              # 184


# ------------------------- Pallas kernel -------------------------
def combined_kernel(tok_ref, gslab_ref, dslab_ref, out_ref):
    D = DENSE_DIM
    SB = tok_ref.shape[0]               # S * BP
    S = SB // BP

    # ---- fused embedding lookup + input projection: one "two-hot" MXU dot ----
    # row t*BP+b selects: fwd token (b,t), V + bwd token (b,S-1-t), and the bias column.
    ids = lax.broadcasted_iota(jnp.int32, (SB, TW), 1)
    tok_f = tok_ref[:, 0:1]                                        # (SB, 1)
    tok_b = tok_ref[:, 1:2]                                        # (SB, 1), already offset by V
    twohot = ((ids == tok_f) | (ids == tok_b) | (ids == BIAS_COL)).astype(jnp.float32)
    table = gslab_ref[ROW_TABLE:ROW_TABLE + TW, :]                 # (128, 384)
    gi_all = jnp.dot(twohot, table, preferred_element_type=jnp.float32)   # (SB, 384)
    # gi_all = x @ W_ih + bih (all gates) + bhh_{r,z}; gate lanes [r | z | n], 128 each

    whh = gslab_ref[ROW_WHH:ROW_WHH + H2, :]                       # (128, 384) block-diag
    bhh_n = dslab_ref[DROW_BHN:DROW_BHN + BP, :]                   # (8, 128) pre-replicated

    # ---- fused bidirectional recurrence, fully unrolled (one MXU dot / step) ----
    # t = 0: h == 0 so gh == 0 — skip the hidden matmul entirely.
    gi = gi_all[0:BP, :]
    r = jax.nn.sigmoid(gi[:, 0:H2])
    z = jax.nn.sigmoid(gi[:, H2:2 * H2])
    n = jnp.tanh(gi[:, 2 * H2:3 * H2] + r * bhh_n)
    h = n - z * n
    for t in range(1, S):
        gi = gi_all[t * BP:(t + 1) * BP, :]                        # (8, 384), static slice
        gh = jnp.dot(h, whh, preferred_element_type=jnp.float32)   # (8, 384)
        r = jax.nn.sigmoid(gi[:, 0:H2] + gh[:, 0:H2])
        z = jax.nn.sigmoid(gi[:, H2:2 * H2] + gh[:, H2:2 * H2])
        n = jnp.tanh(gi[:, 2 * H2:3 * H2] + r * (gh[:, 2 * H2:3 * H2] + bhh_n))
        h = n + z * (h - n)                                        # == (1-z)*n + z*h

    # h == concat(h_n_fwd, h_n_bwd)  -> matches torch.cat((x[0], x[1]), dim=-1)

    # ---- dense head + lane-dense softmax (pad classes carry bias -1e30 -> prob 0) ----
    w1 = dslab_ref[DROW_W1:DROW_W1 + H2, 0:D]                      # (128, 32)
    w2 = dslab_ref[DROW_W2:DROW_W2 + D, :]                         # (32, 128)
    b1 = dslab_ref[DROW_B1:DROW_B1 + BP, 0:D]                      # (8, 32)
    b2 = dslab_ref[DROW_B2:DROW_B2 + BP, :]                        # (8, 128)
    h1 = jnp.maximum(jnp.dot(h, w1, preferred_element_type=jnp.float32) + b1, 0.0)
    logits = jnp.dot(h1, w2, preferred_element_type=jnp.float32) + b2
    m = jnp.max(logits, axis=-1, keepdims=True)
    e = jnp.exp(logits - m)
    out_ref[...] = e / jnp.sum(e, axis=-1, keepdims=True)


# ------------------------- wrapper -------------------------
@jax.jit
def combined_forward(tokens, packed):
    B, S = tokens.shape
    # pad batch to 8 sublanes; build per-(t,b) fwd / (V + bwd) token id pairs
    tok_p = jnp.zeros((BP, S), jnp.int32).at[:B, :].set(tokens.astype(jnp.int32))
    tok_f = tok_p.T.reshape(S * BP, 1)                              # fwd token (b, t)
    tok_b = (tok_p.T[::-1, :] + VOCAB_SIZE).reshape(S * BP, 1)      # V + token (b, S-1-t)
    tok2 = jnp.concatenate([tok_f, tok_b], axis=1)                  # (S*BP, 2) int32

    out = pl.pallas_call(
        combined_kernel,
        out_shape=jax.ShapeDtypeStruct((BP, LANES), jnp.float32),
        in_specs=[pl.BlockSpec(memory_space=pltpu.MemorySpace.VMEM)] * 3,
        out_specs=pl.BlockSpec(memory_space=pltpu.MemorySpace.VMEM),
    )(tok2, packed["gslab"], packed["dslab"])
    return out[:B, :NUM_CLASSES]


# ------------------------- host-side parameter packing -------------------------
def pack_params(p):
    """Pack the PyTorch-layout tensors into two slabs with the fused gate layout."""
    H = HIDDEN
    D = DENSE_DIM
    C = NUM_CLASSES
    V = VOCAB_SIZE

    def to_np(x):
        return np.asarray(x, np.float32)

    def gate_cols(direction, g):
        # lanes of gate g (0=r,1=z,2=n) for direction (0=fwd, 1=bwd)
        s = g * H2 + direction * H
        return slice(s, s + H)

    emb = to_np(p["embedding"])                                # (V, E)
    wih_f, wih_b = to_np(p["wih_f"]), to_np(p["wih_b"])        # (E, 3H), gates [r|z|n]
    whh_f, whh_b = to_np(p["whh_f"]), to_np(p["whh_b"])        # (H, 3H)
    bih_f, bih_b = to_np(p["bih_f"]).reshape(-1), to_np(p["bih_b"]).reshape(-1)
    bhh_f, bhh_b = to_np(p["bhh_f"]).reshape(-1), to_np(p["bhh_b"]).reshape(-1)

    # fused (embedding @ W_ih) table + always-hot bias row
    xf = emb @ wih_f                                           # (V, 3H)
    xb = emb @ wih_b
    table = np.zeros((TW, GPACK), np.float32)
    for g in range(3):
        table[0:V, gate_cols(0, g)] = xf[:, g * H:(g + 1) * H]
        table[V:2 * V, gate_cols(1, g)] = xb[:, g * H:(g + 1) * H]
        # bias row: bih for all gates, bhh only for r and z (bhh_n stays in-loop)
        table[BIAS_COL, gate_cols(0, g)] = bih_f[g * H:(g + 1) * H] + \
            (bhh_f[g * H:(g + 1) * H] if g < 2 else 0.0)
        table[BIAS_COL, gate_cols(1, g)] = bih_b[g * H:(g + 1) * H] + \
            (bhh_b[g * H:(g + 1) * H] if g < 2 else 0.0)

    # block-diagonal hidden projection for h = [h_fwd | h_bwd]
    whh = np.zeros((H2, GPACK), np.float32)
    for g in range(3):
        whh[0:H, gate_cols(0, g)] = whh_f[:, g * H:(g + 1) * H]
        whh[H:H2, gate_cols(1, g)] = whh_b[:, g * H:(g + 1) * H]

    gslab = np.concatenate([table, whh], axis=0)               # (256, 384)

    # narrow 128-lane dense-head slab + pre-replicated biases
    w1, b1 = to_np(p["w1"]), to_np(p["b1"]).reshape(-1)        # (2H, D), (D,)
    w2, b2 = to_np(p["w2"]), to_np(p["b2"]).reshape(-1)        # (D, C), (C,)
    bhh_n = np.concatenate([bhh_f[2 * H:3 * H], bhh_b[2 * H:3 * H]])   # (2H,)

    dslab = np.zeros((DSLAB_ROWS, LANES), np.float32)
    dslab[DROW_W1:DROW_W1 + H2, 0:D] = w1
    dslab[DROW_W2:DROW_W2 + D, 0:C] = w2
    dslab[DROW_BHN:DROW_BHN + BP, :] = np.tile(bhh_n[None, :], (BP, 1))
    dslab[DROW_B1:DROW_B1 + BP, 0:D] = np.tile(b1[None, :], (BP, 1))
    b2p = np.full((LANES,), -1e30, np.float32)                 # pad classes -> softmax ~0
    b2p[0:C] = b2
    dslab[DROW_B2:DROW_B2 + BP, :] = np.tile(b2p[None, :], (BP, 1))

    return {"gslab": jnp.asarray(gslab), "dslab": jnp.asarray(dslab)}


# ------------------------- deterministic parameter init (PyTorch layout) -------------------------
def init_params(key):
    ks = jax.random.split(key, 16)
    kq = 1.0 / np.sqrt(HIDDEN)

    def u(k, shape, bound):
        return jax.random.uniform(k, shape, jnp.float32, minval=-bound, maxval=bound)

    params = {
        "embedding": jax.random.normal(ks[0], (VOCAB_SIZE, EMBED_DIM), jnp.float32),
        # forward GRU direction (stored transposed: (in, 3H), gates [r,z,n])
        "wih_f": u(ks[1], (3 * HIDDEN, EMBED_DIM), kq).T,
        "whh_f": u(ks[2], (3 * HIDDEN, HIDDEN), kq).T,
        "bih_f": u(ks[3], (3 * HIDDEN,), kq).reshape(1, -1),
        "bhh_f": u(ks[4], (3 * HIDDEN,), kq).reshape(1, -1),
        # backward GRU direction
        "wih_b": u(ks[5], (3 * HIDDEN, EMBED_DIM), kq).T,
        "whh_b": u(ks[6], (3 * HIDDEN, HIDDEN), kq).T,
        "bih_b": u(ks[7], (3 * HIDDEN,), kq).reshape(1, -1),
        "bhh_b": u(ks[8], (3 * HIDDEN,), kq).reshape(1, -1),
        # Linear(2H -> DENSE_DIM)
        "w1": u(ks[9], (2 * HIDDEN, DENSE_DIM), 1.0 / np.sqrt(2 * HIDDEN)),
        "b1": u(ks[10], (DENSE_DIM,), 1.0 / np.sqrt(2 * HIDDEN)).reshape(1, -1),
        # Linear(DENSE_DIM -> NUM_CLASSES)
        "w2": u(ks[11], (DENSE_DIM, NUM_CLASSES), 1.0 / np.sqrt(DENSE_DIM)),
        "b2": u(ks[12], (NUM_CLASSES,), 1.0 / np.sqrt(DENSE_DIM)).reshape(1, -1),
    }
    return params


# ------------------------- pure-JAX reference (for correctness check) -------------------------
def reference_forward(tokens, p):
    emb = jnp.take(p["embedding"], tokens, axis=0)  # (B, S, E)
    H = HIDDEN

    def cell(x_t, h, wih, whh, bih, bhh):
        gi = x_t @ wih + bih
        gh = h @ whh + bhh
        r = jax.nn.sigmoid(gi[:, :H] + gh[:, :H])
        z = jax.nn.sigmoid(gi[:, H:2 * H] + gh[:, H:2 * H])
        n = jnp.tanh(gi[:, 2 * H:] + r * gh[:, 2 * H:])
        return (1.0 - z) * n + z * h

    B, S, _ = emb.shape
    h_f = jnp.zeros((B, H), jnp.float32)
    h_b = jnp.zeros((B, H), jnp.float32)
    for t in range(S):
        h_f = cell(emb[:, t, :], h_f, p["wih_f"], p["whh_f"], p["bih_f"], p["bhh_f"])
        h_b = cell(emb[:, S - 1 - t, :], h_b, p["wih_b"], p["whh_b"], p["bih_b"], p["bhh_b"])
    hcat = jnp.concatenate([h_f, h_b], axis=-1)
    h1 = jnp.maximum(hcat @ p["w1"] + p["b1"], 0.0)
    logits = h1 @ p["w2"] + p["b2"]
    return jax.nn.softmax(logits, axis=-1)


if __name__ == "__main__":
    key = jax.random.PRNGKey(0)
    pkey, xkey = jax.random.split(key)
    params = init_params(pkey)
    packed = pack_params(params)

    # token ids, shape (batch=2, seq=8)
    tokens = jax.random.randint(xkey, (BATCH, SEQ), 0, VOCAB_SIZE, dtype=jnp.int32)

    out = combined_forward(tokens, packed)
    out = jax.block_until_ready(out)

    ref = reference_forward(tokens, params)
    np.testing.assert_allclose(np.asarray(out), np.asarray(ref), rtol=1e-3, atol=1e-4)
    assert out.shape == (BATCH, NUM_CLASSES)
    np.testing.assert_allclose(np.asarray(out).sum(axis=-1), np.ones(BATCH), rtol=1e-4)

    print("KERNEL_OK")
</pallas_src>

<mosaic_0001>
module attributes {stable_mosaic.version = 11 : i64} {
  func.func @combined_kernel(%arg0: memref<64x2xi32, #tpu.memory_space<vmem>>, %arg1: memref<256x384xf32, #tpu.memory_space<vmem>>, %arg2: memref<184x128xf32, #tpu.memory_space<vmem>>, %arg3: memref<8x128xf32, #tpu.memory_space<vmem>>) attributes {dimension_semantics = [], scalar_prefetch = 0 : i64, scratch_operands = 0 : i64, tpu.core_type = #tpu.core_type<tc>} {
    %0 = tpu.iota {dimensions = array<i32: 1>} : vector<64x128xi32>
    %c0 = arith.constant 0 : index
    %c0_0 = arith.constant 0 : index
    %1 = vector.load %arg0[%c0, %c0_0] : memref<64x2xi32, #tpu.memory_space<vmem>>, vector<64x1xi32>
    %c0_1 = arith.constant 0 : index
    %c1 = arith.constant 1 : index
    %2 = vector.load %arg0[%c0_1, %c1] : memref<64x2xi32, #tpu.memory_space<vmem>>, vector<64x1xi32>
    %3 = vector.broadcast %1 : vector<64x1xi32> to vector<64x128xi32>
    %4 = arith.cmpi eq, %0, %3 : vector<64x128xi32>
    %5 = vector.broadcast %2 : vector<64x1xi32> to vector<64x128xi32>
    %6 = arith.cmpi eq, %0, %5 : vector<64x128xi32>
    %7 = arith.ori %4, %6 : vector<64x128xi1>
    %c100_i32 = arith.constant 100 : i32
    %8 = vector.broadcast %c100_i32 : i32 to vector<64x128xi32>
    %9 = arith.cmpi eq, %0, %8 : vector<64x128xi32>
    %10 = arith.ori %7, %9 : vector<64x128xi1>
    %11 = arith.extui %10 : vector<64x128xi1> to vector<64x128xi32>
    %12 = arith.sitofp %11 : vector<64x128xi32> to vector<64x128xf32>
    %c0_2 = arith.constant 0 : index
    %c0_3 = arith.constant 0 : index
    %13 = vector.load %arg1[%c0_2, %c0_3] : memref<256x384xf32, #tpu.memory_space<vmem>>, vector<128x384xf32>
    %cst = arith.constant dense<0.000000e+00> : vector<64x384xf32>
    %14 = tpu.matmul %12, %13, %cst {dimension_numbers = #tpu.dot_dimension_numbers<[1], [0], [0], [1], [0, 0, 1, 1], [], []>} : vector<64x128xf32>, vector<128x384xf32>, vector<64x384xf32> -> vector<64x384xf32>
    %c128 = arith.constant 128 : index
    %c0_4 = arith.constant 0 : index
    %15 = vector.load %arg1[%c128, %c0_4] : memref<256x384xf32, #tpu.memory_space<vmem>>, vector<128x384xf32>
    %c160 = arith.constant 160 : index
    %c0_5 = arith.constant 0 : index
    %16 = vector.load %arg2[%c160, %c0_5] : memref<184x128xf32, #tpu.memory_space<vmem>>, vector<8x128xf32>
    %17 = vector.extract_strided_slice %14 {offsets = [0, 0], sizes = [8, 384], strides = [1, 1]} : vector<64x384xf32> to vector<8x384xf32>
    %18 = vector.extract_strided_slice %17 {offsets = [0, 0], sizes = [8, 128], strides = [1, 1]} : vector<8x384xf32> to vector<8x128xf32>
    %19 = arith.negf %18 : vector<8x128xf32>
    %20 = math.exp %19 : vector<8x128xf32>
    %cst_6 = arith.constant 1.000000e+00 : f32
    %21 = vector.broadcast %cst_6 : f32 to vector<8x128xf32>
    %22 = arith.addf %21, %20 : vector<8x128xf32>
    %23 = arith.divf %21, %22 : vector<8x128xf32>
    %24 = vector.extract_strided_slice %17 {offsets = [0, 128], sizes = [8, 128], strides = [1, 1]} : vector<8x384xf32> to vector<8x128xf32>
    %25 = arith.negf %24 : vector<8x128xf32>
    %26 = math.exp %25 : vector<8x128xf32>
    %cst_7 = arith.constant 1.000000e+00 : f32
    %27 = vector.broadcast %cst_7 : f32 to vector<8x128xf32>
    %28 = arith.addf %27, %26 : vector<8x128xf32>
    %29 = arith.divf %27, %28 : vector<8x128xf32>
    %30 = vector.extract_strided_slice %17 {offsets = [0, 256], sizes = [8, 128], strides = [1, 1]} : vector<8x384xf32> to vector<8x128xf32>
    %31 = arith.mulf %23, %16 : vector<8x128xf32>
    %32 = arith.addf %30, %31 : vector<8x128xf32>
    %33 = math.tanh %32 : vector<8x128xf32>
    %34 = arith.mulf %29, %33 : vector<8x128xf32>
    %35 = arith.subf %33, %34 : vector<8x128xf32>
    %36 = vector.extract_strided_slice %14 {offsets = [8, 0], sizes = [8, 384], strides = [1, 1]} : vector<64x384xf32> to vector<8x384xf32>
    %cst_8 = arith.constant dense<0.000000e+00> : vector<8x384xf32>
    %37 = tpu.matmul %35, %15, %cst_8 {dimension_numbers = #tpu.dot_dimension_numbers<[1], [0], [0], [1], [0, 0, 1, 1], [], []>} : vector<8x128xf32>, vector<128x384xf32>, vector<8x384xf32> -> vector<8x384xf32>
    %38 = vector.extract_strided_slice %36 {offsets = [0, 0], sizes = [8, 128], strides = [1, 1]} : vector<8x384xf32> to vector<8x128xf32>
    %39 = vector.extract_strided_slice %37 {offsets = [0, 0], sizes = [8, 128], strides = [1, 1]} : vector<8x384xf32> to vector<8x128xf32>
    %40 = arith.addf %38, %39 : vector<8x128xf32>
    %41 = arith.negf %40 : vector<8x128xf32>
    %42 = math.exp %41 : vector<8x128xf32>
    %cst_9 = arith.constant 1.000000e+00 : f32
    %43 = vector.broadcast %cst_9 : f32 to vector<8x128xf32>
    %44 = arith.addf %43, %42 : vector<8x128xf32>
    %45 = arith.divf %43, %44 : vector<8x128xf32>
    %46 = vector.extract_strided_slice %36 {offsets = [0, 128], sizes = [8, 128], strides = [1, 1]} : vector<8x384xf32> to vector<8x128xf32>
    %47 = vector.extract_strided_slice %37 {offsets = [0, 128], sizes = [8, 128], strides = [1, 1]} : vector<8x384xf32> to vector<8x128xf32>
    %48 = arith.addf %46, %47 : vector<8x128xf32>
    %49 = arith.negf %48 : vector<8x128xf32>
    %50 = math.exp %49 : vector<8x128xf32>
    %cst_10 = arith.constant 1.000000e+00 : f32
    %51 = vector.broadcast %cst_10 : f32 to vector<8x128xf32>
    %52 = arith.addf %51, %50 : vector<8x128xf32>
    %53 = arith.divf %51, %52 : vector<8x128xf32>
    %54 = vector.extract_strided_slice %36 {offsets = [0, 256], sizes = [8, 128], strides = [1, 1]} : vector<8x384xf32> to vector<8x128xf32>
    %55 = vector.extract_strided_slice %37 {offsets = [0, 256], sizes = [8, 128], strides = [1, 1]} : vector<8x384xf32> to vector<8x128xf32>
    %56 = arith.addf %55, %16 : vector<8x128xf32>
    %57 = arith.mulf %45, %56 : vector<8x128xf32>
    %58 = arith.addf %54, %57 : vector<8x128xf32>
    %59 = math.tanh %58 : vector<8x128xf32>
    %60 = arith.subf %35, %59 : vector<8x128xf32>
    %61 = arith.mulf %53, %60 : vector<8x128xf32>
    %62 = arith.addf %59, %61 : vector<8x128xf32>
    %63 = vector.extract_strided_slice %14 {offsets = [16, 0], sizes = [8, 384], strides = [1, 1]} : vector<64x384xf32> to vector<8x384xf32>
    %cst_11 = arith.constant dense<0.000000e+00> : vector<8x384xf32>
    %64 = tpu.matmul %62, %15, %cst_11 {dimension_numbers = #tpu.dot_dimension_numbers<[1], [0], [0], [1], [0, 0, 1, 1], [], []>} : vector<8x128xf32>, vector<128x384xf32>, vector<8x384xf32> -> vector<8x384xf32>
    %65 = vector.extract_strided_slice %63 {offsets = [0, 0], sizes = [8, 128], strides = [1, 1]} : vector<8x384xf32> to vector<8x128xf32>
    %66 = vector.extract_strided_slice %64 {offsets = [0, 0], sizes = [8, 128], strides = [1, 1]} : vector<8x384xf32> to vector<8x128xf32>
    %67 = arith.addf %65, %66 : vector<8x128xf32>
    %68 = arith.negf %67 : vector<8x128xf32>
    %69 = math.exp %68 : vector<8x128xf32>
    %cst_12 = arith.constant 1.000000e+00 : f32
    %70 = vector.broadcast %cst_12 : f32 to vector<8x128xf32>
    %71 = arith.addf %70, %69 : vector<8x128xf32>
    %72 = arith.divf %70, %71 : vector<8x128xf32>
    %73 = vector.extract_strided_slice %63 {offsets = [0, 128], sizes = [8, 128], strides = [1, 1]} : vector<8x384xf32> to vector<8x128xf32>
    %74 = vector.extract_strided_slice %64 {offsets = [0, 128], sizes = [8, 128], strides = [1, 1]} : vector<8x384xf32> to vector<8x128xf32>
    %75 = arith.addf %73, %74 : vector<8x128xf32>
    %76 = arith.negf %75 : vector<8x128xf32>
    %77 = math.exp %76 : vector<8x128xf32>
    %cst_13 = arith.constant 1.000000e+00 : f32
    %78 = vector.broadcast %cst_13 : f32 to vector<8x128xf32>
    %79 = arith.addf %78, %77 : vector<8x128xf32>
    %80 = arith.divf %78, %79 : vector<8x128xf32>
    %81 = vector.extract_strided_slice %63 {offsets = [0, 256], sizes = [8, 128], strides = [1, 1]} : vector<8x384xf32> to vector<8x128xf32>
    %82 = vector.extract_strided_slice %64 {offsets = [0, 256], sizes = [8, 128], strides = [1, 1]} : vector<8x384xf32> to vector<8x128xf32>
    %83 = arith.addf %82, %16 : vector<8x128xf32>
    %84 = arith.mulf %72, %83 : vector<8x128xf32>
    %85 = arith.addf %81, %84 : vector<8x128xf32>
    %86 = math.tanh %85 : vector<8x128xf32>
    %87 = arith.subf %62, %86 : vector<8x128xf32>
    %88 = arith.mulf %80, %87 : vector<8x128xf32>
    %89 = arith.addf %86, %88 : vector<8x128xf32>
    %90 = vector.extract_strided_slice %14 {offsets = [24, 0], sizes = [8, 384], strides = [1, 1]} : vector<64x384xf32> to vector<8x384xf32>
    %cst_14 = arith.constant dense<0.000000e+00> : vector<8x384xf32>
    %91 = tpu.matmul %89, %15, %cst_14 {dimension_numbers = #tpu.dot_dimension_numbers<[1], [0], [0], [1], [0, 0, 1, 1], [], []>} : vector<8x128xf32>, vector<128x384xf32>, vector<8x384xf32> -> vector<8x384xf32>
    %92 = vector.extract_strided_slice %90 {offsets = [0, 0], sizes = [8, 128], strides = [1, 1]} : vector<8x384xf32> to vector<8x128xf32>
    %93 = vector.extract_strided_slice %91 {offsets = [0, 0], sizes = [8, 128], strides = [1, 1]} : vector<8x384xf32> to vector<8x128xf32>
    %94 = arith.addf %92, %93 : vector<8x128xf32>
    %95 = arith.negf %94 : vector<8x128xf32>
    %96 = math.exp %95 : vector<8x128xf32>
    %cst_15 = arith.constant 1.000000e+00 : f32
    %97 = vector.broadcast %cst_15 : f32 to vector<8x128xf32>
    %98 = arith.addf %97, %96 : vector<8x128xf32>
    %99 = arith.divf %97, %98 : vector<8x128xf32>
    %100 = vector.extract_strided_slice %90 {offsets = [0, 128], sizes = [8, 128], strides = [1, 1]} : vector<8x384xf32> to vector<8x128xf32>
    %101 = vector.extract_strided_slice %91 {offsets = [0, 128], sizes = [8, 128], strides = [1, 1]} : vector<8x384xf32> to vector<8x128xf32>
    %102 = arith.addf %100, %101 : vector<8x128xf32>
    %103 = arith.negf %102 : vector<8x128xf32>
    %104 = math.exp %103 : vector<8x128xf32>
    %cst_16 = arith.constant 1.000000e+00 : f32
    %105 = vector.broadcast %cst_16 : f32 to vector<8x128xf32>
    %106 = arith.addf %105, %104 : vector<8x128xf32>
    %107 = arith.divf %105, %106 : vector<8x128xf32>
    %108 = vector.extract_strided_slice %90 {offsets = [0, 256], sizes = [8, 128], strides = [1, 1]} : vector<8x384xf32> to vector<8x128xf32>
    %109 = vector.extract_strided_slice %91 {offsets = [0, 256], sizes = [8, 128], strides = [1, 1]} : vector<8x384xf32> to vector<8x128xf32>
    %110 = arith.addf %109, %16 : vector<8x128xf32>
    %111 = arith.mulf %99, %110 : vector<8x128xf32>
    %112 = arith.addf %108, %111 : vector<8x128xf32>
    %113 = math.tanh %112 : vector<8x128xf32>
    %114 = arith.subf %89, %113 : vector<8x128xf32>
    %115 = arith.mulf %107, %114 : vector<8x128xf32>
    %116 = arith.addf %113, %115 : vector<8x128xf32>
    %117 = vector.extract_strided_slice %14 {offsets = [32, 0], sizes = [8, 384], strides = [1, 1]} : vector<64x384xf32> to vector<8x384xf32>
    %cst_17 = arith.constant dense<0.000000e+00> : vector<8x384xf32>
    %118 = tpu.matmul %116, %15, %cst_17 {dimension_numbers = #tpu.dot_dimension_numbers<[1], [0], [0], [1], [0, 0, 1, 1], [], []>} : vector<8x128xf32>, vector<128x384xf32>, vector<8x384xf32> -> vector<8x384xf32>
    %119 = vector.extract_strided_slice %117 {offsets = [0, 0], sizes = [8, 128], strides = [1, 1]} : vector<8x384xf32> to vector<8x128xf32>
    %120 = vector.extract_strided_slice %118 {offsets = [0, 0], sizes = [8, 128], strides = [1, 1]} : vector<8x384xf32> to vector<8x128xf32>
    %121 = arith.addf %119, %120 : vector<8x128xf32>
    %122 = arith.negf %121 : vector<8x128xf32>
    %123 = math.exp %122 : vector<8x128xf32>
    %cst_18 = arith.constant 1.000000e+00 : f32
    %124 = vector.broadcast %cst_18 : f32 to vector<8x128xf32>
    %125 = arith.addf %124, %123 : vector<8x128xf32>
    %126 = arith.divf %124, %125 : vector<8x128xf32>
    %127 = vector.extract_strided_slice %117 {offsets = [0, 128], sizes = [8, 128], strides = [1, 1]} : vector<8x384xf32> to vector<8x128xf32>
    %128 = vector.extract_strided_slice %118 {offsets = [0, 128], sizes = [8, 128], strides = [1, 1]} : vector<8x384xf32> to vector<8x128xf32>
    %129 = arith.addf %127, %128 : vector<8x128xf32>
    %130 = arith.negf %129 : vector<8x128xf32>
    %131 = math.exp %130 : vector<8x128xf32>
    %cst_19 = arith.constant 1.000000e+00 : f32
    %132 = vector.broadcast %cst_19 : f32 to vector<8x128xf32>
    %133 = arith.addf %132, %131 : vector<8x128xf32>
    %134 = arith.divf %132, %133 : vector<8x128xf32>
    %135 = vector.extract_strided_slice %117 {offsets = [0, 256], sizes = [8, 128], strides = [1, 1]} : vector<8x384xf32> to vector<8x128xf32>
    %136 = vector.extract_strided_slice %118 {offsets = [0, 256], sizes = [8, 128], strides = [1, 1]} : vector<8x384xf32> to vector<8x128xf32>
    %137 = arith.addf %136, %16 : vector<8x128xf32>
    %138 = arith.mulf %126, %137 : vector<8x128xf32>
    %139 = arith.addf %135, %138 : vector<8x128xf32>
    %140 = math.tanh %139 : vector<8x128xf32>
    %141 = arith.subf %116, %140 : vector<8x128xf32>
    %142 = arith.mulf %134, %141 : vector<8x128xf32>
    %143 = arith.addf %140, %142 : vector<8x128xf32>
    %144 = vector.extract_strided_slice %14 {offsets = [40, 0], sizes = [8, 384], strides = [1, 1]} : vector<64x384xf32> to vector<8x384xf32>
    %cst_20 = arith.constant dense<0.000000e+00> : vector<8x384xf32>
    %145 = tpu.matmul %143, %15, %cst_20 {dimension_numbers = #tpu.dot_dimension_numbers<[1], [0], [0], [1], [0, 0, 1, 1], [], []>} : vector<8x128xf32>, vector<128x384xf32>, vector<8x384xf32> -> vector<8x384xf32>
    %146 = vector.extract_strided_slice %144 {offsets = [0, 0], sizes = [8, 128], strides = [1, 1]} : vector<8x384xf32> to vector<8x128xf32>
    %147 = vector.extract_strided_slice %145 {offsets = [0, 0], sizes = [8, 128], strides = [1, 1]} : vector<8x384xf32> to vector<8x128xf32>
    %148 = arith.addf %146, %147 : vector<8x128xf32>
    %149 = arith.negf %148 : vector<8x128xf32>
    %150 = math.exp %149 : vector<8x128xf32>
    %cst_21 = arith.constant 1.000000e+00 : f32
    %151 = vector.broadcast %cst_21 : f32 to vector<8x128xf32>
    %152 = arith.addf %151, %150 : vector<8x128xf32>
    %153 = arith.divf %151, %152 : vector<8x128xf32>
    %154 = vector.extract_strided_slice %144 {offsets = [0, 128], sizes = [8, 128], strides = [1, 1]} : vector<8x384xf32> to vector<8x128xf32>
    %155 = vector.extract_strided_slice %145 {offsets = [0, 128], sizes = [8, 128], strides = [1, 1]} : vector<8x384xf32> to vector<8x128xf32>
    %156 = arith.addf %154, %155 : vector<8x128xf32>
    %157 = arith.negf %156 : vector<8x128xf32>
    %158 = math.exp %157 : vector<8x128xf32>
    %cst_22 = arith.constant 1.000000e+00 : f32
    %159 = vector.broadcast %cst_22 : f32 to vector<8x128xf32>
    %160 = arith.addf %159, %158 : vector<8x128xf32>
    %161 = arith.divf %159, %160 : vector<8x128xf32>
    %162 = vector.extract_strided_slice %144 {offsets = [0, 256], sizes = [8, 128], strides = [1, 1]} : vector<8x384xf32> to vector<8x128xf32>
    %163 = vector.extract_strided_slice %145 {offsets = [0, 256], sizes = [8, 128], strides = [1, 1]} : vector<8x384xf32> to vector<8x128xf32>
    %164 = arith.addf %163, %16 : vector<8x128xf32>
    %165 = arith.mulf %153, %164 : vector<8x128xf32>
    %166 = arith.addf %162, %165 : vector<8x128xf32>
    %167 = math.tanh %166 : vector<8x128xf32>
    %168 = arith.subf %143, %167 : vector<8x128xf32>
    %169 = arith.mulf %161, %168 : vector<8x128xf32>
    %170 = arith.addf %167, %169 : vector<8x128xf32>
    %171 = vector.extract_strided_slice %14 {offsets = [48, 0], sizes = [8, 384], strides = [1, 1]} : vector<64x384xf32> to vector<8x384xf32>
    %cst_23 = arith.constant dense<0.000000e+00> : vector<8x384xf32>
    %172 = tpu.matmul %170, %15, %cst_23 {dimension_numbers = #tpu.dot_dimension_numbers<[1], [0], [0], [1], [0, 0, 1, 1], [], []>} : vector<8x128xf32>, vector<128x384xf32>, vector<8x384xf32> -> vector<8x384xf32>
    %173 = vector.extract_strided_slice %171 {offsets = [0, 0], sizes = [8, 128], strides = [1, 1]} : vector<8x384xf32> to vector<8x128xf32>
    %174 = vector.extract_strided_slice %172 {offsets = [0, 0], sizes = [8, 128], strides = [1, 1]} : vector<8x384xf32> to vector<8x128xf32>
    %175 = arith.addf %173, %174 : vector<8x128xf32>
    %176 = arith.negf %175 : vector<8x128xf32>
    %177 = math.exp %176 : vector<8x128xf32>
    %cst_24 = arith.constant 1.000000e+00 : f32
    %178 = vector.broadcast %cst_24 : f32 to vector<8x128xf32>
    %179 = arith.addf %178, %177 : vector<8x128xf32>
    %180 = arith.divf %178, %179 : vector<8x128xf32>
    %181 = vector.extract_strided_slice %171 {offsets = [0, 128], sizes = [8, 128], strides = [1, 1]} : vector<8x384xf32> to vector<8x128xf32>
    %182 = vector.extract_strided_slice %172 {offsets = [0, 128], sizes = [8, 128], strides = [1, 1]} : vector<8x384xf32> to vector<8x128xf32>
    %183 = arith.addf %181, %182 : vector<8x128xf32>
    %184 = arith.negf %183 : vector<8x128xf32>
    %185 = math.exp %184 : vector<8x128xf32>
    %cst_25 = arith.constant 1.000000e+00 : f32
    %186 = vector.broadcast %cst_25 : f32 to vector<8x128xf32>
    %187 = arith.addf %186, %185 : vector<8x128xf32>
    %188 = arith.divf %186, %187 : vector<8x128xf32>
    %189 = vector.extract_strided_slice %171 {offsets = [0, 256], sizes = [8, 128], strides = [1, 1]} : vector<8x384xf32> to vector<8x128xf32>
    %190 = vector.extract_strided_slice %172 {offsets = [0, 256], sizes = [8, 128], strides = [1, 1]} : vector<8x384xf32> to vector<8x128xf32>
    %191 = arith.addf %190, %16 : vector<8x128xf32>
    %192 = arith.mulf %180, %191 : vector<8x128xf32>
    %193 = arith.addf %189, %192 : vector<8x128xf32>
    %194 = math.tanh %193 : vector<8x128xf32>
    %195 = arith.subf %170, %194 : vector<8x128xf32>
    %196 = arith.mulf %188, %195 : vector<8x128xf32>
    %197 = arith.addf %194, %196 : vector<8x128xf32>
    %198 = vector.extract_strided_slice %14 {offsets = [56, 0], sizes = [8, 384], strides = [1, 1]} : vector<64x384xf32> to vector<8x384xf32>
    %cst_26 = arith.constant dense<0.000000e+00> : vector<8x384xf32>
    %199 = tpu.matmul %197, %15, %cst_26 {dimension_numbers = #tpu.dot_dimension_numbers<[1], [0], [0], [1], [0, 0, 1, 1], [], []>} : vector<8x128xf32>, vector<128x384xf32>, vector<8x384xf32> -> vector<8x384xf32>
    %200 = vector.extract_strided_slice %198 {offsets = [0, 0], sizes = [8, 128], strides = [1, 1]} : vector<8x384xf32> to vector<8x128xf32>
    %201 = vector.extract_strided_slice %199 {offsets = [0, 0], sizes = [8, 128], strides = [1, 1]} : vector<8x384xf32> to vector<8x128xf32>
    %202 = arith.addf %200, %201 : vector<8x128xf32>
    %203 = arith.negf %202 : vector<8x128xf32>
    %204 = math.exp %203 : vector<8x128xf32>
    %cst_27 = arith.constant 1.000000e+00 : f32
    %205 = vector.broadcast %cst_27 : f32 to vector<8x128xf32>
    %206 = arith.addf %205, %204 : vector<8x128xf32>
    %207 = arith.divf %205, %206 : vector<8x128xf32>
    %208 = vector.extract_strided_slice %198 {offsets = [0, 128], sizes = [8, 128], strides = [1, 1]} : vector<8x384xf32> to vector<8x128xf32>
    %209 = vector.extract_strided_slice %199 {offsets = [0, 128], sizes = [8, 128], strides = [1, 1]} : vector<8x384xf32> to vector<8x128xf32>
    %210 = arith.addf %208, %209 : vector<8x128xf32>
    %211 = arith.negf %210 : vector<8x128xf32>
    %212 = math.exp %211 : vector<8x128xf32>
    %cst_28 = arith.constant 1.000000e+00 : f32
    %213 = vector.broadcast %cst_28 : f32 to vector<8x128xf32>
    %214 = arith.addf %213, %212 : vector<8x128xf32>
    %215 = arith.divf %213, %214 : vector<8x128xf32>
    %216 = vector.extract_strided_slice %198 {offsets = [0, 256], sizes = [8, 128], strides = [1, 1]} : vector<8x384xf32> to vector<8x128xf32>
    %217 = vector.extract_strided_slice %199 {offsets = [0, 256], sizes = [8, 128], strides = [1, 1]} : vector<8x384xf32> to vector<8x128xf32>
    %218 = arith.addf %217, %16 : vector<8x128xf32>
    %219 = arith.mulf %207, %218 : vector<8x128xf32>
    %220 = arith.addf %216, %219 : vector<8x128xf32>
    %221 = math.tanh %220 : vector<8x128xf32>
    %222 = arith.subf %197, %221 : vector<8x128xf32>
    %223 = arith.mulf %215, %222 : vector<8x128xf32>
    %224 = arith.addf %221, %223 : vector<8x128xf32>
    %c0_29 = arith.constant 0 : index
    %c0_30 = arith.constant 0 : index
    %225 = vector.load %arg2[%c0_29, %c0_30] : memref<184x128xf32, #tpu.memory_space<vmem>>, vector<128x32xf32>
    %c128_31 = arith.constant 128 : index
    %c0_32 = arith.constant 0 : index
    %226 = vector.load %arg2[%c128_31, %c0_32] : memref<184x128xf32, #tpu.memory_space<vmem>>, vector<32x128xf32>
    %c168 = arith.constant 168 : index
    %c0_33 = arith.constant 0 : index
    %227 = vector.load %arg2[%c168, %c0_33] : memref<184x128xf32, #tpu.memory_space<vmem>>, vector<8x32xf32>
    %c176 = arith.constant 176 : index
    %c0_34 = arith.constant 0 : index
    %228 = vector.load %arg2[%c176, %c0_34] : memref<184x128xf32, #tpu.memory_space<vmem>>, vector<8x128xf32>
    %cst_35 = arith.constant dense<0.000000e+00> : vector<8x32xf32>
    %229 = tpu.matmul %224, %225, %cst_35 {dimension_numbers = #tpu.dot_dimension_numbers<[1], [0], [0], [1], [0, 0, 1, 1], [], []>} : vector<8x128xf32>, vector<128x32xf32>, vector<8x32xf32> -> vector<8x32xf32>
    %230 = arith.addf %229, %227 : vector<8x32xf32>
    %cst_36 = arith.constant 0.000000e+00 : f32
    %231 = vector.broadcast %cst_36 : f32 to vector<8x32xf32>
    %232 = arith.maximumf %230, %231 : vector<8x32xf32>
    %cst_37 = arith.constant dense<0.000000e+00> : vector<8x128xf32>
    %233 = tpu.matmul %232, %226, %cst_37 {dimension_numbers = #tpu.dot_dimension_numbers<[1], [0], [0], [1], [0, 0, 1, 1], [], []>} : vector<8x32xf32>, vector<32x128xf32>, vector<8x128xf32> -> vector<8x128xf32>
    %234 = arith.addf %233, %228 : vector<8x128xf32>
    %cst_38 = arith.constant dense<0xFF800000> : vector<8xf32>
    %235 = vector.multi_reduction <maximumf>, %234, %cst_38 [1] : vector<8x128xf32> to vector<8xf32>
    %236 = vector.shape_cast %235 : vector<8xf32> to vector<8x1xf32>
    %237 = vector.broadcast %236 : vector<8x1xf32> to vector<8x128xf32>
    %238 = arith.subf %234, %237 : vector<8x128xf32>
    %239 = math.exp %238 : vector<8x128xf32>
    %cst_39 = arith.constant dense<0.000000e+00> : vector<8xf32>
    %240 = vector.multi_reduction <add>, %239, %cst_39 [1] : vector<8x128xf32> to vector<8xf32>
    %241 = vector.shape_cast %240 : vector<8xf32> to vector<8x1xf32>
    %242 = vector.broadcast %241 : vector<8x1xf32> to vector<8x128xf32>
    %243 = arith.divf %239, %242 : vector<8x128xf32>
    %c0_40 = arith.constant 0 : index
    %c0_41 = arith.constant 0 : index
    %244 = vector.load %arg3[%c0_40, %c0_41] : memref<8x128xf32, #tpu.memory_space<vmem>>, vector<8x128xf32>
    tpu.vector_store %arg3[%c0_40, %c0_41], %243 {strides = array<i32>} : memref<8x128xf32, #tpu.memory_space<vmem>>, vector<8x128xf32>,
    return
  }
}

</mosaic_0001>

<bundles_post_ra>
// kernel: combined_forward.1
= control target key start
LH: loop header
LB: loop body
LE: loop exit
PB: predicated region body
PF: predicated region fallthrough
CT: control target
= control target key end

     0   :  { %8 = vsyncpa [#allocation3], 0  ;;  %s3457_s0 = inlined_call_operand.vmem [shape: s32[64,2], index: 0, kind: input, shape index: {}]   ;;  %s3458_s1 = inlined_call_operand.hbm [shape: f32[256,384], index: 1, kind: input, shape index: {}]   ;;  %s3459_s2 = inlined_call_operand.hbm [shape: f32[184,128], index: 2, kind: input, shape index: {}]   ;;  %s3460_s3 = inlined_call_operand.vmem [shape: f32[8,128], index: 3, kind: output, shape index: {}]  }
   0x1   :  { %9 = vsyncpa [#allocation5], 0  ;;  %s2988_s12 = smov [#allocation2]   ;;  %s2940_s16 = scalar_lea.hbm %s3458_s1, 12288 }
   0x2   :  { %s17_s13 = sshll.u32 %s2988_s12, 4  ;;  %p2941_p0 = scmp.ne.s32.totalorder %s3458_s1, %s2940_s16  ;;  %s18_s13 = int_to_ptr.vmem [resolvable:$true] %s17_s13 }
   0x3   :  { %p2944_p1 = scmp.lt.u32.totalorder %s2940_s16, %s3458_s1 }
   0x5   :  { %p2946_p2 = pnand %p2944_p1, %p2941_p0 }
   0x7   :  { %2949 = shalt.err (!%p2946_p2)
}
   0x8   :  { %s2950_s21 = scalar_lea.vmem %s18_s13, 12288  ;;  %p2955_p4 = scmp.lt.s32.totalorder %s18_s13, %s18_s13 }
   0x9   :  { %p2951_p3 = scmp.ne.s32.totalorder %s18_s13, %s2950_s21  ;;  %p2956_p5 = scmp.lt.s32.totalorder %s2950_s21, %s2950_s21 }
   0xb   :  { %p2957_p6 = por %p2956_p5, %p2955_p4 }
   0xd   :  { %p2958_p7 = pnand %p2957_p6, %p2951_p3 }
   0xf   :  { %2961 = shalt.err (!%p2958_p7)
}
  0x10   :  { %s2989_s22 = smov 384   ;;  %s2990_s23 = smov 24  }
  0x11   :  { %23 = dma.hbm_to_vmem [thread:$0]  %s3458_s1, 12288, %s18_s13, [#allocation3], %s2989_s22, %s2989_s22, %s2990_s23  }
  0x12   :  { %s2991_s26 = smov [#allocation4]   ;;  %s2962_s30 = scalar_lea.hbm %s3459_s2, 2944 }
  0x13   :  { %s29_s27 = sshll.u32 %s2991_s26, 4  ;;  %p2963_p8 = scmp.ne.s32.totalorder %s3459_s2, %s2962_s30  ;;  %s30_s27 = int_to_ptr.vmem [resolvable:$true] %s29_s27 }
  0x14   :  { %p2966_p9 = scmp.lt.u32.totalorder %s2962_s30, %s3459_s2 }
  0x16   :  { %p2968_p10 = pnand %p2966_p9, %p2963_p8 }
  0x18   :  { %2971 = shalt.err (!%p2968_p10)
}
  0x19   :  { %s2972_s8 = scalar_lea.vmem %s30_s27, 2944  ;;  %p2977_p12 = scmp.lt.s32.totalorder %s30_s27, %s30_s27 }
  0x1a   :  { %p2973_p11 = scmp.ne.s32.totalorder %s30_s27, %s2972_s8  ;;  %p2978_p13 = scmp.lt.s32.totalorder %s2972_s8, %s2972_s8 }
  0x1c   :  { %p2979_p0 = por %p2978_p13, %p2977_p12 }
  0x1e   :  { %p2980_p1 = pnand %p2979_p0, %p2973_p11 }
  0x20   :  { %2983 = shalt.err (!%p2980_p1)
}
  0x21   :  { %s2992_s1 = smov 128   ;;  %s2993_s9 = smov 8  }
  0x22   :  { %35 = dma.hbm_to_vmem [thread:$0]  %s3459_s2, 2944, %s30_s27, [#allocation5], %s2992_s1, %s2992_s1, %s2993_s9  }
  0x23   :  { %2984 = dma.done.wait [#allocation3], 12288  }
  0x24   :  { %2985 = vsyncadd [#allocation3], 4294955008 }
  0x25   :  { %2986 = dma.done.wait [#allocation5], 2944  }
  0x26   :  { %2987 = vsyncadd [#allocation5], 4294964352  ;;  %v2994_v0 = vmov 0   ;;  %v45_v1 = vld [vmem:[%s3457_s0 + $0x8] sm:$0xff]  ;;  %v44_v2 = vld [vmem:[%s3457_s0] sm:$0xff]  ;;  %v2995_v12 = vmov 1  }
  0x27   :  { %2853 = vset.pattern.permute.xlu1 %v2994_v0  ;;  %2851 = vset.pattern.permute.xlu0 %v2994_v0  ;;  %v150_v3 = vld [vmem:[#allocation2 + $0x8] sm:$0xff]  ;;  %v153_v4 = vld [vmem:[#allocation2 + $0x20] sm:$0xff]  ;;  %v152_v6 = vld [vmem:[#allocation2 + $0x18] sm:$0xff]  ;;  %v2996_v37 = vmov 0.0  }
  0x28   :  { %56 = vperm.xlu1 %2853, %v45_v1   ;;  %53 = vperm.xlu0 %2851, %v44_v2   ;;  %v149_v5 = vld [vmem:[#allocation2] sm:$0xff]  ;;  %v2339_v7 = vpack.c.bf16 %v153_v4, %v150_v3  ;;  %v156_v9 = vld [vmem:[#allocation2 + $0x38] sm:$0xff]  ;;  %v159_v10 = vld [vmem:[#allocation2 + $0x50] sm:$0xff] }
  0x29   :  { %v2341_v8 = vpack.c.bf16 %v152_v6, %v149_v5  ;;  %v151_v11 = vld [vmem:[#allocation2 + $0x10] sm:$0xff]  ;;  %v2343_v13 = vpack.c.bf16 %v159_v10, %v156_v9  ;;  %v154_v14 = vld [vmem:[#allocation2 + $0x28] sm:$0xff]  ;;  %v165_v19 = vld [vmem:[#allocation2 + $0x80] sm:$0xff]  ;;  %261 = vmatprep.mubr.f32.mxu0 %v2996_v37 }
  0x2a   :  { %v155_v15 = vld [vmem:[#allocation2 + $0x30] sm:$0xff]  ;;  %v158_v16 = vld [vmem:[#allocation2 + $0x48] sm:$0xff]  ;;  %v2371_v17 = vpack.c.bf16 %v154_v14, %v151_v11  ;;  %v157_v20 = vld [vmem:[#allocation2 + $0x40] sm:$0xff]  ;;  %2340 = vmatprep.subr.bf16.mxu0 %v2339_v7 }
  0x2b   :  { %v162_v18 = vld [vmem:[#allocation2 + $0x68] sm:$0xff]  ;;  %v46_v21 = vld [vmem:[%s3457_s0 + $0x10] sm:$0xff]  ;;  %v160_v22 = vld [vmem:[#allocation2 + $0x58] sm:$0xff]  ;;  %2342 = vmatpush1.bf16.msra.mxu0 %v2341_v8  ;;  %v2345_v23 = vpack.c.bf16 %v158_v16, %v155_v15 }
  0x2c   :  { %2854 = vset.pattern.permute.xlu1 %v2995_v12  ;;  %2852 = vset.pattern.permute.xlu0 %v2995_v12  ;;  %v2375_v24 = vpack.c.bf16 %v160_v22, %v157_v20  ;;  %v163_v25 = vld [vmem:[#allocation2 + $0x70] sm:$0xff]  ;;  %v2347_v26 = vpack.c.bf16 %v165_v19, %v162_v18  ;;  %v161_v27 = vld [vmem:[#allocation2 + $0x60] sm:$0xff]  ;;  %v164_v28 = vld [vmem:[#allocation2 + $0x78] sm:$0xff]  ;;  %v42_v19 = vlaneseq }
  0x2d   :  { %88 = vperm.xlu1 %2854, %v45_v1   ;;  %85 = vperm.xlu0 %2852, %v44_v2   ;;  %v166_v29 = vld [vmem:[#allocation2 + $0x88] sm:$0xff]  ;;  %v168_v30 = vld [vmem:[#allocation2 + $0x98] sm:$0xff]  ;;  %v171_v31 = vld [vmem:[#allocation2 + $0xb0] sm:$0xff]  ;;  %v2349_v36 = vpack.c.bf16 %v164_v28, %v161_v27 }
  0x2e   :  { %2372 = vmatprep.subr.bf16.mxu1 %v2371_v17  ;;  %2344 = vmatprep.subr.bf16.mxu0 %v2343_v13  ;;  %v2379_v32 = vpack.c.bf16 %v166_v29, %v163_v25  ;;  %v47_v33 = vld [vmem:[%s3457_s0 + $0x18] sm:$0xff]  ;;  %v169_v34 = vld [vmem:[#allocation2 + $0xa0] sm:$0xff]  ;;  %v2351_v38 = vpack.c.bf16 %v171_v31, %v168_v30  ;;  %v167_v39 = vld [vmem:[#allocation2 + $0x90] sm:$0xff]  ;;  %v3069_v22 = vand.u32 127, %v42_v19  ;;  %v2997_v25 = vmov 1.0  }
  0x2f   :  { %2374 = vmatpush3.bf16.msra.mxu1 %v2371_v17  ;;  %v172_v35 = vld [vmem:[#allocation2 + $0xb8] sm:$0xff]  ;;  %2346 = vmatpush1.bf16.msra.mxu0 %v2345_v23  ;;  %v170_v40 = vld [vmem:[#allocation2 + $0xa8] sm:$0xff]  ;;  %v177_v42 = vld [vmem:[#allocation2 + $0xe0] sm:$0xff] }
  0x30   :  { %2376 = vmatprep.subr.bf16.mxu1 %v2375_v24  ;;  %2348 = vmatprep.subr.bf16.mxu0 %v2347_v26  ;;  %v174_v41 = vld [vmem:[#allocation2 + $0xc8] sm:$0xff]  ;;  %v2383_v43 = vpack.c.bf16 %v172_v35, %v169_v34  ;;  %v48_v44 = vld [vmem:[%s3457_s0 + $0x20] sm:$0xff]  ;;  %v175_v45 = vld [vmem:[#allocation2 + $0xd0] sm:$0xff]  ;;  %v2353_v47 = vpack.c.bf16 %v170_v40, %v167_v39  ;;  %vm124_vm0 = vcmp.eq.s32.totalorder %v3069_v22, 100 }
  0x31   :  { %2855 = vset.pattern.permute.xlu1 %v2994_v0  ;;  %91 = vperm.xlu0 %2852, %v46_v21   ;;  %v178_v46 = vld [vmem:[#allocation2 + $0xe8] sm:$0xff]  ;;  %v2355_v48 = vpack.c.bf16 %v177_v42, %v174_v41  ;;  %v173_v49 = vld [vmem:[#allocation2 + $0xc0] sm:$0xff]  ;;  %v176_v50 = vld [vmem:[#allocation2 + $0xd8] sm:$0xff] }
  0x32   :  { %59 = vperm.xlu1 %2855, %v46_v21   ;;  %v180_v51 = vld [vmem:[#allocation2 + $0xf8] sm:$0xff]  ;;  %v183_v52 = vld [vmem:[#allocation2 + $0x110] sm:$0xff]  ;;  %v2387_v53 = vpack.c.bf16 %v178_v46, %v175_v45  ;;  %v49_v54 = vld [vmem:[%s3457_s0 + $0x28] sm:$0xff]  ;;  %v2357_v57 = vpack.c.bf16 %v176_v50, %v173_v49 }
  0x33   :  { %2378 = vmatpush3.bf16.msra.mxu1 %v2375_v24  ;;  %2350 = vmatpush1.bf16.msra.mxu0 %v2349_v36  ;;  %v181_v55 = vld [vmem:[#allocation2 + $0x100] sm:$0xff]  ;;  %v184_v56 = vld [vmem:[#allocation2 + $0x118] sm:$0xff]  ;;  %v2359_v58 = vpack.c.bf16 %v183_v52, %v180_v51  ;;  %v179_v59 = vld [vmem:[#allocation2 + $0xf0] sm:$0xff] }
  0x34   :  { %2380 = vmatprep.subr.bf16.mxu1 %v2379_v32  ;;  %2352 = vmatprep.subr.bf16.mxu0 %v2351_v38  ;;  %v182_v60 = vld [vmem:[#allocation2 + $0x108] sm:$0xff]  ;;  %v189_v62 = vld [vmem:[#allocation2 + $0x140] sm:$0xff]  ;;  %v2391_v63 = vpack.c.bf16 %v184_v56, %v181_v55  ;;  %v50_v0 = vld [vmem:[%s3457_s0 + $0x30] sm:$0xff] }
  0x35   :  { %94 = vperm.xlu0 %2852, %v47_v33   ;;  %v186_v61 = vld [vmem:[#allocation2 + $0x128] sm:$0xff]  ;;  %v187_v1 = vld [vmem:[#allocation2 + $0x130] sm:$0xff]  ;;  %v2361_v3 = vpack.c.bf16 %v182_v60, %v179_v59  ;;  %v185_v5 = vld [vmem:[#allocation2 + $0x120] sm:$0xff] }
  0x36   :  { %62 = vperm.xlu1 %2855, %v47_v33   ;;  %v190_v2 = vld [vmem:[#allocation2 + $0x148] sm:$0xff]  ;;  %v2363_v4 = vpack.c.bf16 %v189_v62, %v186_v61  ;;  %v188_v6 = vld [vmem:[#allocation2 + $0x138] sm:$0xff]  ;;  %v195_v8 = vld [vmem:[#allocation2 + $0x170] sm:$0xff] }
  0x37   :  { %2382 = vmatpush3.bf16.msra.mxu1 %v2379_v32  ;;  %2354 = vmatpush1.bf16.msra.mxu0 %v2353_v47  ;;  %v192_v7 = vld [vmem:[#allocation2 + $0x158] sm:$0xff]  ;;  %v2395_v9 = vpack.c.bf16 %v190_v2, %v187_v1  ;;  %v193_v11 = vld [vmem:[#allocation2 + $0x160] sm:$0xff]  ;;  %v2365_v13 = vpack.c.bf16 %v188_v6, %v185_v5  ;;  %v191_v15 = vld [vmem:[#allocation2 + $0x150] sm:$0xff]  ;;  %v2998_v47 = vmov 0.0|0.0  }
  0x38   :  { %2384 = vmatprep.subr.bf16.mxu1 %v2383_v43  ;;  %2356 = vmatprep.subr.bf16.mxu0 %v2355_v48  ;;  %v51_v10 = vld [vmem:[%s3457_s0 + $0x38] sm:$0xff]  ;;  %v2367_v14 = vpack.c.bf16 %v195_v8, %v192_v7  ;;  %v194_v16 = vld [vmem:[#allocation2 + $0x168] sm:$0xff]  ;;  %v419_v40 = vld [vmem:[#allocation2 + $0x1a0] sm:$0xff] }
  0x39   :  { %97 = vperm.xlu0 %2852, %v48_v44   ;;  %v196_v12 = vld [vmem:[#allocation2 + $0x178] sm:$0xff]  ;;  %v2369_v18 = vpack.c.bf16 %v194_v16, %v191_v15  ;;  %v416_v39 = vld [vmem:[#allocation2 + $0x188] sm:$0xff]  ;;  %v415_v42 = vld [vmem:[#allocation2 + $0x180] sm:$0xff] }
  0x3a   :  { %65 = vperm.xlu1 %2855, %v48_v44   ;;  %v2399_v17 = vpack.c.bf16 %v196_v12, %v193_v11  ;;  %v3112_v41 = vpack.c.bf16 %v419_v40, %v416_v39  ;;  %v417_v44 = vld [vmem:[#allocation2 + $0x190] sm:$0xff]  ;;  %v420_v46 = vld [vmem:[#allocation2 + $0x1a8] sm:$0xff]  ;;  %v422_v49 = vld [vmem:[#allocation2 + $0x1b8] sm:$0xff] }
  0x3b   :  { %2386 = vmatpush3.bf16.msra.mxu1 %v2383_v43  ;;  %2358 = vmatpush1.bf16.msra.mxu0 %v2357_v57  ;;  %v418_v43 = vld [vmem:[#allocation2 + $0x198] sm:$0xff]  ;;  %v3118_v48 = vpack.c.bf16 %v420_v46, %v417_v44  ;;  %v425_v50 = vld [vmem:[#allocation2 + $0x1d0] sm:$0xff]  ;;  %v431_v59 = vld [vmem:[#allocation2 + $0x200] sm:$0xff] }
  0x3c   :  { %2388 = vmatprep.subr.bf16.mxu1 %v2387_v53  ;;  %2360 = vmatprep.subr.bf16.mxu0 %v2359_v58  ;;  %v3114_v45 = vpack.c.bf16 %v418_v43, %v415_v42  ;;  %v3122_v51 = vpack.c.bf16 %v425_v50, %v422_v49  ;;  %v421_v52 = vld [vmem:[#allocation2 + $0x1b0] sm:$0xff]  ;;  %v426_v56 = vld [vmem:[#allocation2 + $0x1d8] sm:$0xff]  ;;  %v428_v58 = vld [vmem:[#allocation2 + $0x1e8] sm:$0xff] }
  0x3d   :  { %100 = vperm.xlu0 %2852, %v49_v54   ;;  %v3132_v60 = vpack.c.bf16 %v431_v59, %v428_v58  ;;  %v427_v61 = vld [vmem:[#allocation2 + $0x1e0] sm:$0xff]  ;;  %v430_v62 = vld [vmem:[#allocation2 + $0x1f8] sm:$0xff]  ;;  %v432_v1 = vld [vmem:[#allocation2 + $0x208] sm:$0xff] }
  0x3e   :  { %68 = vperm.xlu1 %2855, %v49_v54   ;;  %v423_v54 = vld [vmem:[#allocation2 + $0x1c0] sm:$0xff]  ;;  %v433_v6 = vld [vmem:[#allocation2 + $0x210] sm:$0xff]  ;;  %v436_v7 = vld [vmem:[#allocation2 + $0x228] sm:$0xff] }
  0x3f   :  { %2390 = vmatpush3.bf16.msra.mxu1 %v2387_v53  ;;  %2362 = vmatpush1.bf16.msra.mxu0 %v2361_v3  ;;  %v424_v53 = vld [vmem:[#allocation2 + $0x1c8] sm:$0xff]  ;;  %v3128_v57 = vpack.c.bf16 %v426_v56, %v423_v54  ;;  %v434_v3 = vld [vmem:[#allocation2 + $0x218] sm:$0xff]  ;;  %v435_v8 = vld [vmem:[#allocation2 + $0x220] sm:$0xff] }
  0x40   :  { %2392 = vmatprep.subr.bf16.mxu1 %v2391_v63  ;;  %2364 = vmatprep.subr.bf16.mxu0 %v2363_v4  ;;  %v3124_v55 = vpack.c.bf16 %v424_v53, %v421_v52  ;;  %v437_v4 = vld [vmem:[#allocation2 + $0x230] sm:$0xff]  ;;  %v440_v12 = vld [vmem:[#allocation2 + $0x248] sm:$0xff]  ;;  %v439_v15 = vld [vmem:[#allocation2 + $0x240] sm:$0xff] }
  0x41   :  { %103 = vperm.xlu0 %2852, %v50_v0   ;;  %v3142_v5 = vpack.c.bf16 %v437_v4, %v434_v3  ;;  %v442_v16 = vld [vmem:[#allocation2 + $0x258] sm:$0xff]  ;;  %v444_v19 = vld [vmem:[#allocation2 + $0x268] sm:$0xff]  ;;  %v461_v42 = vld [vmem:[#allocation2 + $0x2f0] sm:$0xff] }
  0x42   :  { %71 = vperm.xlu1 %2855, %v50_v0   ;;  %v3134_v0 = vpack.c.bf16 %v430_v62, %v427_v61  ;;  %v458_v40 = vld [vmem:[#allocation2 + $0x2d8] sm:$0xff]  ;;  %v457_v44 = vld [vmem:[#allocation2 + $0x2d0] sm:$0xff]  ;;  %v460_v46 = vld [vmem:[#allocation2 + $0x2e8] sm:$0xff] }
  0x43   :  { %2394 = vmatpush3.bf16.msra.mxu1 %v2391_v63  ;;  %2366 = vmatpush1.bf16.msra.mxu0 %v2365_v13  ;;  %v429_v63 = vld [vmem:[#allocation2 + $0x1f0] sm:$0xff]  ;;  %v443_v13 = vld [vmem:[#allocation2 + $0x260] sm:$0xff]  ;;  %v3182_v43 = vpack.c.bf16 %v461_v42, %v458_v40  ;;  %v3184_v50 = vpack.c.bf16 %v460_v46, %v457_v44  ;;  %v462_v52 = vld [vmem:[#allocation2 + $0x2f8] sm:$0xff] }
  0x44   :  { %2396 = vmatprep.subr.bf16.mxu1 %v2395_v9  ;;  %2368 = vmatprep.subr.bf16.mxu0 %v2367_v14  ;;  %v3138_v2 = vpack.c.bf16 %v432_v1, %v429_v63  ;;  %v3152_v14 = vpack.c.bf16 %v443_v13, %v440_v12  ;;  %v459_v49 = vld [vmem:[#allocation2 + $0x2e0] sm:$0xff] }
  0x45   :  { %106 = vperm.xlu0 %2852, %v51_v10   ;;  %v3188_v53 = vpack.c.bf16 %v462_v52, %v459_v49 }
  0x46   :  { %74 = vperm.xlu1 %2855, %v51_v10   ;;  %v438_v10 = vld [vmem:[#allocation2 + $0x238] sm:$0xff] }
  0x47   :  { %2398 = vmatpush3.bf16.msra.mxu1 %v2395_v9  ;;  %2370 = vmatpush1.bf16.msra.mxu0 %v2369_v18  ;;  %v3144_v9 = vpack.c.bf16 %v436_v7, %v433_v6  ;;  %v3148_v11 = vpack.c.bf16 %v438_v10, %v435_v8  ;;  %v3154_v18 = vpack.c.bf16 %v442_v16, %v439_v15  ;;  %v3206_v10 = vld [vmem:[#allocation4 + $0xa0] sm:$0xff] }
  0x48   :  { %2400 = vmatprep.subr.bf16.mxu1 %v2399_v17  ;;  %2404 = vmatprep.subr.bf16.mxu0 %v3112_v41 }
  0x4b   :  { %2402 = vmatpush3.bf16.msra.mxu1 %v2399_v17  ;;  %v441_v17 = vld [vmem:[#allocation2 + $0x250] sm:$0xff] }
  0x4c   :  { %2435 = vmatprep.subr.bf16.mxu1 %v2998_v47 }
  0xa7   :  { %v54_v20 = vpop.permute.xlu0 %53  ;;  %v57_v21 = vpop.permute.xlu1 %56 }
  0xa8   :  { %vm76_vm1 = vcmp.eq.s32.totalorder %v3069_v22, %v54_v20  ;;  %vm77_vm2 = vcmp.eq.s32.totalorder %v3069_v22, %v57_v21  ;;  %v3158_v20 = vpack.c.bf16 %v444_v19, %v441_v17  ;;  %v446_v21 = vld [vmem:[#allocation2 + $0x278] sm:$0xff] }
  0xac   :  { %v86_v23 = vpop.permute.xlu0 %85  ;;  %v89_v24 = vpop.permute.xlu1 %88 }
  0xad   :  { %vm108_vm3 = vcmp.eq.s32.totalorder %v3069_v22, %v86_v23  ;;  %vm109_vm4 = vcmp.eq.s32.totalorder %v3069_v22, %v89_v24  ;;  %v445_v24 = vld [vmem:[#allocation2 + $0x270] sm:$0xff] }
  0xae   :  { %vm116_vm5 = vmor %vm76_vm1, %vm108_vm3 }
  0xaf   :  { %vm125_vm6 = vmor %vm116_vm5, %vm124_vm0 }
  0xb0   :  { %vm117_vm7 = vmor %vm77_vm2, %vm109_vm4  ;;  %1806 = vmatmul.mubr.msk.f32.vlgmr.msra.gmra.mrb[0].mxu0 %vm125_vm6, %v2997_v25  ;;  %2036 = vmatprep.mubr.msk.f32.mxu1 %vm125_vm6, %v2997_v25  ;;  %v92_v26 = vpop.permute.xlu0 %91 }
  0xb1   :  { %vm126_vm8 = vmor %vm117_vm7, %vm124_vm0  ;;  %vm110_vm9 = vcmp.eq.s32.totalorder %v3069_v22, %v92_v26  ;;  %v60_v27 = vpop.permute.xlu1 %59  ;;  %267 = vmatprep.mubr.f32.mxu0 %v2996_v37  ;;  %2406 = vmatpush1.bf16.msra.mxu0 %v3114_v45  ;;  %v447_v26 = vld [vmem:[#allocation2 + $0x280] sm:$0xff] }
  0xb2   :  { %vm78_vm10 = vcmp.eq.s32.totalorder %v3069_v22, %v60_v27  ;;  %2037 = vmatmul.mubr.msk.f32.vlgmr.msra.gmra.mrb[0].mxu1 %vm126_vm8, %v2997_v25  ;;  %2408 = vmatprep.subr.bf16.mxu0 %v3122_v51 }
  0xb3   :  { %vm118_vm11 = vmor %vm78_vm10, %vm110_vm9  ;;  %2437 = vmatpush3.bf16.msra.mxu1 %v3118_v48 }
  0xb4   :  { %vm127_vm12 = vmor %vm118_vm11, %vm124_vm0  ;;  %1807 = vmatmul.mubr.msk.f32.gmra.mrb[2].mxu0 %vm126_vm8, %v2997_v25  ;;  %v95_v28 = vpop.permute.xlu0 %94  ;;  %2438 = vmatprep.subr.bf16.mxu1 %v2998_v47 }
  0xb5   :  { %vm111_vm13 = vcmp.eq.s32.totalorder %v3069_v22, %v95_v28  ;;  %v63_v29 = vpop.permute.xlu1 %62  ;;  %2039 = vmatprep.mubr.msk.f32.mxu1 %vm127_vm12, %v2997_v25  ;;  %273 = vmatprep.mubr.f32.mxu0 %v2996_v37  ;;  %v450_v28 = vld [vmem:[#allocation2 + $0x298] sm:$0xff] }
  0xb6   :  { %vm79_vm14 = vcmp.eq.s32.totalorder %v3069_v22, %v63_v29  ;;  %2410 = vmatpush1.bf16.msra.mxu0 %v3124_v55  ;;  %v3168_v29 = vpack.c.bf16 %v450_v28, %v447_v26 }
  0xb7   :  { %vm119_vm15 = vmor %vm79_vm14, %vm111_vm13  ;;  %2440 = vmatpush3.bf16.msra.mxu1 %v3128_v57  ;;  %2412 = vmatprep.subr.bf16.mxu0 %v3132_v60 }
  0xb8   :  { %vm128_vm1 = vmor %vm119_vm15, %vm124_vm0  ;;  %1808 = vmatmul.mubr.msk.f32.gmra.mrb[4].mxu0 %vm127_vm12, %v2997_v25  ;;  %v98_v30 = vpop.permute.xlu0 %97  ;;  %2441 = vmatprep.subr.bf16.mxu1 %v2998_v47 }
  0xb9   :  { %vm112_vm2 = vcmp.eq.s32.totalorder %v3069_v22, %v98_v30  ;;  %v66_v31 = vpop.permute.xlu1 %65  ;;  %2040 = vmatmul.mubr.msk.f32.gmra.mrb[2].mxu1 %vm128_vm1, %v2997_v25  ;;  %279 = vmatprep.mubr.f32.mxu0 %v2996_v37  ;;  %v452_v30 = vld [vmem:[#allocation2 + $0x2a8] sm:$0xff] }
  0xba   :  { %vm80_vm3 = vcmp.eq.s32.totalorder %v3069_v22, %v66_v31  ;;  %2414 = vmatpush1.bf16.msra.mxu0 %v3134_v0  ;;  %v455_v31 = vld [vmem:[#allocation2 + $0x2c0] sm:$0xff] }
  0xbb   :  { %vm120_vm4 = vmor %vm80_vm3, %vm112_vm2  ;;  %2443 = vmatpush3.bf16.msra.mxu1 %v3138_v2  ;;  %2416 = vmatprep.subr.bf16.mxu0 %v3142_v5  ;;  %vm1708_vm3 = vcmask 261120  }
  0xbc   :  { %vm129_vm5 = vmor %vm120_vm4, %vm124_vm0  ;;  %1809 = vmatmul.mubr.msk.f32.gmra.mrb[6].mxu0 %vm128_vm1, %v2997_v25  ;;  %v101_v32 = vpop.permute.xlu0 %100  ;;  %2444 = vmatprep.subr.bf16.mxu1 %v2998_v47 }
  0xbd   :  { %vm113_vm6 = vcmp.eq.s32.totalorder %v3069_v22, %v101_v32  ;;  %v69_v33 = vpop.permute.xlu1 %68  ;;  %2042 = vmatprep.mubr.msk.f32.mxu1 %vm129_vm5, %v2997_v25  ;;  %285 = vmatprep.mubr.f32.mxu0 %v2996_v37  ;;  %v3172_v32 = vpack.c.bf16 %v455_v31, %v452_v30 }
  0xbe   :  { %vm81_vm7 = vcmp.eq.s32.totalorder %v3069_v22, %v69_v33  ;;  %2418 = vmatpush1.bf16.msra.mxu0 %v3144_v9  ;;  %v451_v33 = vld [vmem:[#allocation2 + $0x2a0] sm:$0xff] }
  0xbf   :  { %vm121_vm8 = vmor %vm81_vm7, %vm113_vm6  ;;  %2446 = vmatpush3.bf16.msra.mxu1 %v3148_v11  ;;  %2420 = vmatprep.subr.bf16.mxu0 %v3152_v14 }
  0xc0   :  { %vm130_vm9 = vmor %vm121_vm8, %vm124_vm0  ;;  %1810 = vmatmul.mubr.msk.f32.gmra.mrb[8].mxu0 %vm129_vm5, %v2997_v25  ;;  %v104_v34 = vpop.permute.xlu0 %103  ;;  %2447 = vmatprep.subr.bf16.mxu1 %v2998_v47 }
  0xc1   :  { %vm114_vm10 = vcmp.eq.s32.totalorder %v3069_v22, %v104_v34  ;;  %v72_v35 = vpop.permute.xlu1 %71  ;;  %2043 = vmatmul.mubr.msk.f32.gmra.mrb[4].mxu1 %vm130_vm9, %v2997_v25  ;;  %291 = vmatprep.mubr.f32.mxu0 %v2996_v37  ;;  %v454_v34 = vld [vmem:[#allocation2 + $0x2b8] sm:$0xff] }
  0xc2   :  { %vm82_vm11 = vcmp.eq.s32.totalorder %v3069_v22, %v72_v35  ;;  %2422 = vmatpush1.bf16.msra.mxu0 %v3154_v18  ;;  %v453_v35 = vld [vmem:[#allocation2 + $0x2b0] sm:$0xff] }
  0xc3   :  { %vm122_vm12 = vmor %vm82_vm11, %vm114_vm10  ;;  %2449 = vmatpush3.bf16.msra.mxu1 %v3158_v20 }
  0xc4   :  { %vm131_vm13 = vmor %vm122_vm12, %vm124_vm0  ;;  %1811 = vmatmul.mubr.msk.f32.gmra.mrb[10].mxu0 %vm130_vm9, %v2997_v25  ;;  %v107_v36 = vpop.permute.xlu0 %106  ;;  %2450 = vmatprep.subr.bf16.mxu1 %v2998_v47 }
  0xc5   :  { %vm115_vm14 = vcmp.eq.s32.totalorder %v3069_v22, %v107_v36  ;;  %v75_v38 = vpop.permute.xlu1 %74  ;;  %2045 = vmatprep.mubr.msk.f32.mxu1 %vm131_vm13, %v2997_v25  ;;  %297 = vmatprep.mubr.f32.mxu0 %v2996_v37  ;;  %v3174_v36 = vpack.c.bf16 %v454_v34, %v451_v33 }
  0xc6   :  { %vm83_vm15 = vcmp.eq.s32.totalorder %v3069_v22, %v75_v38  ;;  %v449_v22 = vld [vmem:[#allocation2 + $0x290] sm:$0xff]  ;;  %v456_v38 = vld [vmem:[#allocation2 + $0x2c8] sm:$0xff] }
  0xc7   :  { %vm123_vm1 = vmor %vm83_vm15, %vm115_vm14  ;;  %v3162_v23 = vpack.c.bf16 %v449_v22, %v446_v21  ;;  %2452 = vmatpush3.bf16.msra.mxu1 %v3168_v29  ;;  %v3178_v39 = vpack.c.bf16 %v456_v38, %v453_v35 }
  0xc8   :  { %vm132_vm2 = vmor %vm123_vm1, %vm124_vm0  ;;  %1812 = vmatmul.mubr.msk.f32.gmra.mrb[12].mxu0 %vm131_vm13, %v2997_v25  ;;  %2453 = vmatprep.subr.bf16.mxu1 %v2998_v47  ;;  %vm2999_vm0 = vmmov 0  }
  0xc9   :  { %2046 = vmatmul.mubr.msk.f32.gmra.mrb[6].mxu1 %vm132_vm2, %v2997_v25  ;;  %303 = vmatprep.mubr.f32.mxu0 %v2996_v37 }
  0xca   :  { %2424 = vmatprep.subr.bf16.mxu0 %v3162_v23  ;;  %2080 = vmatprep.mubr.msk.f32.mxu1 %vm2999_vm0, %v2996_v37 }
  0xcb   :  { %2455 = vmatpush3.bf16.msra.mxu1 %v3178_v39 }
  0xcc   :  { %1813 = vmatmul.mubr.msk.f32.gmra.mrb[14].mxu0 %vm132_vm2, %v2997_v25  ;;  %v448_v25 = vld [vmem:[#allocation2 + $0x288] sm:$0xff]  ;;  %2456 = vmatprep.subr.bf16.mxu1 %v2998_v47 }
  0xcd   :  { %545 = vmatprep.mubr.f32.mxu0 %v2996_v37  ;;  %v3164_v27 = vpack.c.bf16 %v448_v25, %v445_v24 }
  0xcf   :  { %2426 = vmatpush1.bf16.msra.mxu0 %v3164_v27  ;;  %2458 = vmatpush3.bf16.msra.mxu1 %v3188_v53 }
  0xd0   :  { %2428 = vmatprep.subr.bf16.mxu0 %v3172_v32  ;;  %2491 = vmatprep.subr.bf16.mxu1 %v2998_v47 }
  0xd3   :  { %2430 = vmatpush1.bf16.msra.mxu0 %v3174_v36 }
  0xd4   :  { %2432 = vmatprep.subr.bf16.mxu0 %v3182_v43 }
  0xd7   :  { %2434 = vmatpush1.bf16.msra.mxu0 %v3184_v50 }
  0xd8   :  { %2460 = vmatprep.subr.bf16.mxu0 %v3112_v41 }
 0x183   :  { %v263_v54 = vpop.f32.mrb[0].mxu0 }
 0x184   :  { %v1822_v56 = vmul.f32 -1.442695, %v263_v54  ;;  %v265_v58 = vpop.f32.mrb[1].mxu0 }
 0x185   :  { %v3196_v59 = vpop.f32.mrb[0].mxu1  ;;  %v1823_v62 = vmul.f32 -1.442695, %v265_v58 }
 0x186   :  { %2856 = vpow2.f32 %v1822_v56  ;;  %v376_v61 = vpop.f32.mrb[1].mxu1 }
 0x187   :  { %2858 = vpow2.f32 %v1823_v62 }
 0x18c   :  { %v3198_v63 = vpop.f32.mrb[2].mxu1 }
 0x18d   :  { %v3200_v1 = vpop.f32.mrb[3].mxu1 }
 0x190   :  { %v2857_v3 = vpop.eup %2856 }
 0x191   :  { %v467_v4 = vadd.f32 1.0, %v2857_v3  ;;  %v2859_v8 = vpop.eup %2858 }
 0x192   :  { %v473_v15 = vadd.f32 1.0, %v2859_v8 }
 0x193   :  { %2860 = vrcp.f32 %v467_v4 }
 0x194   :  { %v3202_v6 = vpop.f32.mrb[4].mxu1  ;;  %2862 = vrcp.f32 %v473_v15 }
 0x195   :  { %v3204_v7 = vpop.f32.mrb[5].mxu1 }
 0x19c   :  { %v3208_v12 = vpop.f32.mrb[6].mxu1 }
 0x19d   :  { %v2861_v13 = vpop.eup %2860  ;;  %v3210_v16 = vpop.f32.mrb[7].mxu1 }
 0x19e   :  { %v476_v17 = vmul.f32 %v2861_v13, %v3206_v10  ;;  %v2863_v21 = vpop.eup %2862 }
 0x1a0   :  { %v477_v19 = vadd.f32 %v476_v17, %v376_v61 }
 0x1a2   :  { %2864 = vtanh.f32 %v477_v19 }
 0x1ac   :  { %v2865_v22 = vpop.eup %2864 }
 0x1ad   :  { %v479_v24 = vmul.f32 %v2865_v22, %v2863_v21 }
 0x1af   :  { %v480_v25 = vsub.f32 %v2865_v22, %v479_v24 }
 0x1b1   :  { %546 = vmatmul.mubr.f32.vlgmr.msra.gmra.mrb[2].mxu0 %v480_v25  ;;  %2081 = vmatmul.mubr.f32.vlgmr.msra.gmra.mrb[8].mxu1 %v480_v25 }
 0x1b2   :  { %2462 = vmatpush1.bf16.msra.mxu0 %v3114_v45  ;;  %2493 = vmatpush3.bf16.msra.mxu1 %v3118_v48 }
 0x1b3   :  { %2464 = vmatprep.subr.bf16.mxu0 %v3122_v51  ;;  %2494 = vmatprep.subr.bf16.mxu1 %v2998_v47 }
 0x1b4   :  { %707 = vmatprep.mubr.f32.mxu0 %v2996_v37  ;;  %2115 = vmatprep.mubr.msk.f32.mxu1 %vm2999_vm0, %v2996_v37 }
 0x1b6   :  { %2466 = vmatpush1.bf16.msra.mxu0 %v3124_v55  ;;  %2496 = vmatpush3.bf16.msra.mxu1 %v3128_v57 }
 0x1b7   :  { %2468 = vmatprep.subr.bf16.mxu0 %v3132_v60  ;;  %2497 = vmatprep.subr.bf16.mxu1 %v2998_v47 }
 0x1ba   :  { %2470 = vmatpush1.bf16.msra.mxu0 %v3134_v0  ;;  %2499 = vmatpush3.bf16.msra.mxu1 %v3138_v2 }
 0x1bb   :  { %2472 = vmatprep.subr.bf16.mxu0 %v3142_v5  ;;  %2500 = vmatprep.subr.bf16.mxu1 %v2998_v47 }
 0x1be   :  { %2474 = vmatpush1.bf16.msra.mxu0 %v3144_v9  ;;  %2502 = vmatpush3.bf16.msra.mxu1 %v3148_v11 }
 0x1bf   :  { %2476 = vmatprep.subr.bf16.mxu0 %v3152_v14  ;;  %2503 = vmatprep.subr.bf16.mxu1 %v2998_v47 }
 0x1c2   :  { %2478 = vmatpush1.bf16.msra.mxu0 %v3154_v18  ;;  %2505 = vmatpush3.bf16.msra.mxu1 %v3158_v20 }
 0x1c3   :  { %2480 = vmatprep.subr.bf16.mxu0 %v3162_v23  ;;  %2506 = vmatprep.subr.bf16.mxu1 %v2998_v47 }
 0x1c6   :  { %2482 = vmatpush1.bf16.msra.mxu0 %v3164_v27  ;;  %2508 = vmatpush3.bf16.msra.mxu1 %v3168_v29 }
 0x1c7   :  { %2484 = vmatprep.subr.bf16.mxu0 %v3172_v32  ;;  %2509 = vmatprep.subr.bf16.mxu1 %v2998_v47 }
 0x1ca   :  { %2486 = vmatpush1.bf16.msra.mxu0 %v3174_v36  ;;  %2511 = vmatpush3.bf16.msra.mxu1 %v3178_v39 }
 0x1cb   :  { %2488 = vmatprep.subr.bf16.mxu0 %v3182_v43  ;;  %2512 = vmatprep.subr.bf16.mxu1 %v2998_v47 }
 0x1ce   :  { %2490 = vmatpush1.bf16.msra.mxu0 %v3184_v50  ;;  %2514 = vmatpush3.bf16.msra.mxu1 %v3188_v53 }
 0x1cf   :  { %2516 = vmatprep.subr.bf16.mxu0 %v3112_v41  ;;  %2547 = vmatprep.subr.bf16.mxu1 %v2998_v47 }
 0x284   :  { %v547_v26 = vpop.f32.mrb[2].mxu0  ;;  %v618_v28 = vpop.f32.mrb[8].mxu1 }
 0x285   :  { %v1824_v30 = vmul.f32 -1.442695, %v547_v26  ;;  %v549_v31 = vpop.f32.mrb[3].mxu0  ;;  %v2082_v33 = vpop.f32.mrb[9].mxu1  ;;  %v636_v42 = vadd.f32 %v618_v28, %v3206_v10 }
 0x286   :  { %v1825_v34 = vmul.f32 -1.442695, %v549_v31 }
 0x287   :  { %2866 = vpow2.f32 %v1824_v30 }
 0x288   :  { %2868 = vpow2.f32 %v1825_v34 }
 0x291   :  { %v2867_v35 = vpop.eup %2866 }
 0x292   :  { %v626_v38 = vadd.f32 1.0, %v2867_v35  ;;  %v2869_v40 = vpop.eup %2868 }
 0x293   :  { %v633_v52 = vadd.f32 1.0, %v2869_v40 }
 0x294   :  { %2870 = vrcp.f32 %v626_v38 }
 0x29e   :  { %v2871_v44 = vpop.eup %2870 }
 0x29f   :  { %v637_v46 = vmul.f32 %v2871_v44, %v636_v42 }
 0x2a1   :  { %v638_v49 = vadd.f32 %v3196_v59, %v637_v46 }
 0x2a3   :  { %2872 = vtanh.f32 %v638_v49 }
 0x2a4   :  { %2874 = vrcp.f32 %v633_v52 }
 0x2ad   :  { %v2873_v54 = vpop.eup %2872 }
 0x2ae   :  { %v640_v56 = vsub.f32 %v480_v25, %v2873_v54  ;;  %v2875_v58 = vpop.eup %2874 }
 0x2b0   :  { %v641_v61 = vmul.f32 %v2875_v58, %v640_v56 }
 0x2b2   :  { %v642_v62 = vadd.f32 %v2873_v54, %v641_v61 }
 0x2b4   :  { %708 = vmatmul.mubr.f32.vlgmr.msra.gmra.mrb[4].mxu0 %v642_v62  ;;  %2116 = vmatmul.mubr.f32.vlgmr.msra.gmra.mrb[10].mxu1 %v642_v62 }
 0x2b5   :  { %2518 = vmatpush1.bf16.msra.mxu0 %v3114_v45  ;;  %2549 = vmatpush3.bf16.msra.mxu1 %v3118_v48 }
 0x2b6   :  { %2520 = vmatprep.subr.bf16.mxu0 %v3122_v51  ;;  %2550 = vmatprep.subr.bf16.mxu1 %v2998_v47 }
 0x2b7   :  { %869 = vmatprep.mubr.f32.mxu0 %v2996_v37  ;;  %2150 = vmatprep.mubr.msk.f32.mxu1 %vm2999_vm0, %v2996_v37 }
 0x2b9   :  { %2522 = vmatpush1.bf16.msra.mxu0 %v3124_v55  ;;  %2552 = vmatpush3.bf16.msra.mxu1 %v3128_v57 }
 0x2ba   :  { %2524 = vmatprep.subr.bf16.mxu0 %v3132_v60  ;;  %2553 = vmatprep.subr.bf16.mxu1 %v2998_v47 }
 0x2bd   :  { %2526 = vmatpush1.bf16.msra.mxu0 %v3134_v0  ;;  %2555 = vmatpush3.bf16.msra.mxu1 %v3138_v2 }
 0x2be   :  { %2528 = vmatprep.subr.bf16.mxu0 %v3142_v5  ;;  %2556 = vmatprep.subr.bf16.mxu1 %v2998_v47 }
 0x2c1   :  { %2530 = vmatpush1.bf16.msra.mxu0 %v3144_v9  ;;  %2558 = vmatpush3.bf16.msra.mxu1 %v3148_v11 }
 0x2c2   :  { %2532 = vmatprep.subr.bf16.mxu0 %v3152_v14  ;;  %2559 = vmatprep.subr.bf16.mxu1 %v2998_v47 }
 0x2c5   :  { %2534 = vmatpush1.bf16.msra.mxu0 %v3154_v18  ;;  %2561 = vmatpush3.bf16.msra.mxu1 %v3158_v20 }
 0x2c6   :  { %2536 = vmatprep.subr.bf16.mxu0 %v3162_v23  ;;  %2562 = vmatprep.subr.bf16.mxu1 %v2998_v47 }
 0x2c9   :  { %2538 = vmatpush1.bf16.msra.mxu0 %v3164_v27  ;;  %2564 = vmatpush3.bf16.msra.mxu1 %v3168_v29 }
 0x2ca   :  { %2540 = vmatprep.subr.bf16.mxu0 %v3172_v32  ;;  %2565 = vmatprep.subr.bf16.mxu1 %v2998_v47 }
 0x2cd   :  { %2542 = vmatpush1.bf16.msra.mxu0 %v3174_v36  ;;  %2567 = vmatpush3.bf16.msra.mxu1 %v3178_v39 }
 0x2ce   :  { %2544 = vmatprep.subr.bf16.mxu0 %v3182_v43  ;;  %2568 = vmatprep.subr.bf16.mxu1 %v2998_v47 }
 0x2d1   :  { %2546 = vmatpush1.bf16.msra.mxu0 %v3184_v50  ;;  %2570 = vmatpush3.bf16.msra.mxu1 %v3188_v53 }
 0x2d2   :  { %2572 = vmatprep.subr.bf16.mxu0 %v3112_v41  ;;  %2603 = vmatprep.subr.bf16.mxu1 %v2998_v47 }
 0x387   :  { %v709_v59 = vpop.f32.mrb[4].mxu0  ;;  %v780_v3 = vpop.f32.mrb[10].mxu1 }
 0x388   :  { %v1826_v4 = vmul.f32 -1.442695, %v709_v59  ;;  %v711_v8 = vpop.f32.mrb[5].mxu0  ;;  %v2117_v13 = vpop.f32.mrb[11].mxu1  ;;  %v798_v22 = vadd.f32 %v780_v3, %v3206_v10 }
 0x389   :  { %v1827_v15 = vmul.f32 -1.442695, %v711_v8 }
 0x38a   :  { %2876 = vpow2.f32 %v1826_v4 }
 0x38b   :  { %2878 = vpow2.f32 %v1827_v15 }
 0x394   :  { %v2877_v17 = vpop.eup %2876 }
 0x395   :  { %v788_v19 = vadd.f32 1.0, %v2877_v17  ;;  %v2879_v21 = vpop.eup %2878 }
 0x396   :  { %v795_v28 = vadd.f32 1.0, %v2879_v21 }
 0x397   :  { %2880 = vrcp.f32 %v788_v19 }
 0x3a1   :  { %v2881_v24 = vpop.eup %2880 }
 0x3a2   :  { %v799_v25 = vmul.f32 %v2881_v24, %v798_v22 }
 0x3a4   :  { %v800_v26 = vadd.f32 %v799_v25, %v3200_v1 }
 0x3a6   :  { %2882 = vtanh.f32 %v800_v26 }
 0x3a7   :  { %2884 = vrcp.f32 %v795_v28 }
 0x3b0   :  { %v2883_v30 = vpop.eup %2882 }
 0x3b1   :  { %v802_v31 = vsub.f32 %v642_v62, %v2883_v30  ;;  %v2885_v33 = vpop.eup %2884 }
 0x3b3   :  { %v803_v34 = vmul.f32 %v2885_v33, %v802_v31 }
 0x3b5   :  { %v804_v35 = vadd.f32 %v2883_v30, %v803_v34 }
 0x3b7   :  { %870 = vmatmul.mubr.f32.vlgmr.msra.gmra.mrb[6].mxu0 %v804_v35  ;;  %2151 = vmatmul.mubr.f32.vlgmr.msra.gmra.mrb[12].mxu1 %v804_v35 }
 0x3b8   :  { %2574 = vmatpush1.bf16.msra.mxu0 %v3114_v45  ;;  %2605 = vmatpush3.bf16.msra.mxu1 %v3118_v48 }
 0x3b9   :  { %2576 = vmatprep.subr.bf16.mxu0 %v3122_v51  ;;  %2606 = vmatprep.subr.bf16.mxu1 %v2998_v47 }
 0x3ba   :  { %1031 = vmatprep.mubr.f32.mxu0 %v2996_v37  ;;  %2185 = vmatprep.mubr.msk.f32.mxu1 %vm2999_vm0, %v2996_v37 }
 0x3bc   :  { %2578 = vmatpush1.bf16.msra.mxu0 %v3124_v55  ;;  %2608 = vmatpush3.bf16.msra.mxu1 %v3128_v57 }
 0x3bd   :  { %2580 = vmatprep.subr.bf16.mxu0 %v3132_v60  ;;  %2609 = vmatprep.subr.bf16.mxu1 %v2998_v47 }
 0x3c0   :  { %2582 = vmatpush1.bf16.msra.mxu0 %v3134_v0  ;;  %2611 = vmatpush3.bf16.msra.mxu1 %v3138_v2 }
 0x3c1   :  { %2584 = vmatprep.subr.bf16.mxu0 %v3142_v5  ;;  %2612 = vmatprep.subr.bf16.mxu1 %v2998_v47 }
 0x3c4   :  { %2586 = vmatpush1.bf16.msra.mxu0 %v3144_v9  ;;  %2614 = vmatpush3.bf16.msra.mxu1 %v3148_v11 }
 0x3c5   :  { %2588 = vmatprep.subr.bf16.mxu0 %v3152_v14  ;;  %2615 = vmatprep.subr.bf16.mxu1 %v2998_v47 }
 0x3c8   :  { %2590 = vmatpush1.bf16.msra.mxu0 %v3154_v18  ;;  %2617 = vmatpush3.bf16.msra.mxu1 %v3158_v20 }
 0x3c9   :  { %2592 = vmatprep.subr.bf16.mxu0 %v3162_v23  ;;  %2618 = vmatprep.subr.bf16.mxu1 %v2998_v47 }
 0x3cc   :  { %2594 = vmatpush1.bf16.msra.mxu0 %v3164_v27  ;;  %2620 = vmatpush3.bf16.msra.mxu1 %v3168_v29 }
 0x3cd   :  { %2596 = vmatprep.subr.bf16.mxu0 %v3172_v32  ;;  %2621 = vmatprep.subr.bf16.mxu1 %v2998_v47 }
 0x3d0   :  { %2598 = vmatpush1.bf16.msra.mxu0 %v3174_v36  ;;  %2623 = vmatpush3.bf16.msra.mxu1 %v3178_v39 }
 0x3d1   :  { %2600 = vmatprep.subr.bf16.mxu0 %v3182_v43  ;;  %2624 = vmatprep.subr.bf16.mxu1 %v2998_v47 }
 0x3d4   :  { %2602 = vmatpush1.bf16.msra.mxu0 %v3184_v50  ;;  %2626 = vmatpush3.bf16.msra.mxu1 %v3188_v53 }
 0x3d5   :  { %2628 = vmatprep.subr.bf16.mxu0 %v3112_v41  ;;  %2659 = vmatprep.subr.bf16.mxu1 %v2998_v47 }
 0x48a   :  { %v871_v1 = vpop.f32.mrb[6].mxu0  ;;  %v942_v38 = vpop.f32.mrb[12].mxu1 }
 0x48b   :  { %v1828_v40 = vmul.f32 -1.442695, %v871_v1  ;;  %v873_v42 = vpop.f32.mrb[7].mxu0  ;;  %v2152_v44 = vpop.f32.mrb[13].mxu1  ;;  %v960_v56 = vadd.f32 %v942_v38, %v3206_v10 }
 0x48c   :  { %v1829_v46 = vmul.f32 -1.442695, %v873_v42 }
 0x48d   :  { %2886 = vpow2.f32 %v1828_v40 }
 0x48e   :  { %2888 = vpow2.f32 %v1829_v46 }
 0x497   :  { %v2887_v49 = vpop.eup %2886 }
 0x498   :  { %v950_v52 = vadd.f32 1.0, %v2887_v49  ;;  %v2889_v54 = vpop.eup %2888 }
 0x499   :  { %v957_v59 = vadd.f32 1.0, %v2889_v54 }
 0x49a   :  { %2890 = vrcp.f32 %v950_v52 }
 0x4a4   :  { %v2891_v58 = vpop.eup %2890 }
 0x4a5   :  { %v961_v61 = vmul.f32 %v2891_v58, %v960_v56 }
 0x4a7   :  { %v962_v62 = vadd.f32 %v3198_v63, %v961_v61 }
 0x4a9   :  { %2892 = vtanh.f32 %v962_v62 }
 0x4aa   :  { %2894 = vrcp.f32 %v957_v59 }
 0x4b3   :  { %v2893_v3 = vpop.eup %2892 }
 0x4b4   :  { %v964_v4 = vsub.f32 %v804_v35, %v2893_v3  ;;  %v2895_v8 = vpop.eup %2894 }
 0x4b6   :  { %v965_v13 = vmul.f32 %v2895_v8, %v964_v4 }
 0x4b8   :  { %v966_v15 = vadd.f32 %v2893_v3, %v965_v13 }
 0x4ba   :  { %1032 = vmatmul.mubr.f32.vlgmr.msra.gmra.mrb[8].mxu0 %v966_v15  ;;  %2186 = vmatmul.mubr.f32.vlgmr.msra.gmra.mrb[14].mxu1 %v966_v15 }
 0x4bb   :  { %2630 = vmatpush1.bf16.msra.mxu0 %v3114_v45  ;;  %2661 = vmatpush3.bf16.msra.mxu1 %v3118_v48 }
 0x4bc   :  { %2632 = vmatprep.subr.bf16.mxu0 %v3122_v51  ;;  %2662 = vmatprep.subr.bf16.mxu1 %v2998_v47 }
 0x4bd   :  { %1193 = vmatprep.mubr.f32.mxu0 %v2996_v37  ;;  %2220 = vmatprep.mubr.msk.f32.mxu1 %vm2999_vm0, %v2996_v37 }
 0x4bf   :  { %2634 = vmatpush1.bf16.msra.mxu0 %v3124_v55  ;;  %2664 = vmatpush3.bf16.msra.mxu1 %v3128_v57 }
 0x4c0   :  { %2636 = vmatprep.subr.bf16.mxu0 %v3132_v60  ;;  %2665 = vmatprep.subr.bf16.mxu1 %v2998_v47 }
 0x4c3   :  { %2638 = vmatpush1.bf16.msra.mxu0 %v3134_v0  ;;  %2667 = vmatpush3.bf16.msra.mxu1 %v3138_v2 }
 0x4c4   :  { %2640 = vmatprep.subr.bf16.mxu0 %v3142_v5  ;;  %2668 = vmatprep.subr.bf16.mxu1 %v2998_v47 }
 0x4c7   :  { %2642 = vmatpush1.bf16.msra.mxu0 %v3144_v9  ;;  %2670 = vmatpush3.bf16.msra.mxu1 %v3148_v11 }
 0x4c8   :  { %2644 = vmatprep.subr.bf16.mxu0 %v3152_v14  ;;  %2671 = vmatprep.subr.bf16.mxu1 %v2998_v47 }
 0x4cb   :  { %2646 = vmatpush1.bf16.msra.mxu0 %v3154_v18  ;;  %2673 = vmatpush3.bf16.msra.mxu1 %v3158_v20 }
 0x4cc   :  { %2648 = vmatprep.subr.bf16.mxu0 %v3162_v23  ;;  %2674 = vmatprep.subr.bf16.mxu1 %v2998_v47 }
 0x4cf   :  { %2650 = vmatpush1.bf16.msra.mxu0 %v3164_v27  ;;  %2676 = vmatpush3.bf16.msra.mxu1 %v3168_v29 }
 0x4d0   :  { %2652 = vmatprep.subr.bf16.mxu0 %v3172_v32  ;;  %2677 = vmatprep.subr.bf16.mxu1 %v2998_v47 }
 0x4d3   :  { %2654 = vmatpush1.bf16.msra.mxu0 %v3174_v36  ;;  %2679 = vmatpush3.bf16.msra.mxu1 %v3178_v39 }
 0x4d4   :  { %2656 = vmatprep.subr.bf16.mxu0 %v3182_v43  ;;  %2680 = vmatprep.subr.bf16.mxu1 %v2998_v47 }
 0x4d7   :  { %2658 = vmatpush1.bf16.msra.mxu0 %v3184_v50  ;;  %2682 = vmatpush3.bf16.msra.mxu1 %v3188_v53 }
 0x4d8   :  { %2684 = vmatprep.subr.bf16.mxu0 %v3112_v41  ;;  %2715 = vmatprep.subr.bf16.mxu1 %v2998_v47 }
 0x58d   :  { %v1033_v63 = vpop.f32.mrb[8].mxu0  ;;  %v1104_v17 = vpop.f32.mrb[14].mxu1 }
 0x58e   :  { %v1830_v19 = vmul.f32 -1.442695, %v1033_v63  ;;  %v1035_v21 = vpop.f32.mrb[9].mxu0  ;;  %v2187_v22 = vpop.f32.mrb[15].mxu1  ;;  %v1122_v30 = vadd.f32 %v1104_v17, %v3206_v10 }
 0x58f   :  { %v1831_v24 = vmul.f32 -1.442695, %v1035_v21  ;;  %v1619_v21 = vld [vmem:[#allocation4 + $0x20] sm:$0xff]  ;;  %v1620_v22 = vld [vmem:[#allocation4 + $0x28] sm:$0xff] }
 0x590   :  { %2896 = vpow2.f32 %v1830_v19 }
 0x591   :  { %2898 = vpow2.f32 %v1831_v24  ;;  %v2802_v24 = vpack.c.bf16 %v1620_v22, %v1619_v21 }
 0x59a   :  { %v2897_v25 = vpop.eup %2896 }
 0x59b   :  { %v1112_v26 = vadd.f32 1.0, %v2897_v25  ;;  %v2899_v28 = vpop.eup %2898  ;;  %v1621_v25 = vld [vmem:[#allocation4 + $0x30] sm:$0xff] }
 0x59c   :  { %v1119_v35 = vadd.f32 1.0, %v2899_v28  ;;  %v1623_v28 = vld [vmem:[#allocation4 + $0x40] sm:$0xff] }
 0x59d   :  { %2900 = vrcp.f32 %v1112_v26 }
 0x5a7   :  { %v2901_v31 = vpop.eup %2900 }
 0x5a8   :  { %v1123_v33 = vmul.f32 %v2901_v31, %v1122_v30  ;;  %v1624_v30 = vld [vmem:[#allocation4 + $0x48] sm:$0xff] }
 0x5a9   :  { %v2808_v31 = vpack.c.bf16 %v1624_v30, %v1623_v28 }
 0x5aa   :  { %v1124_v34 = vadd.f32 %v1123_v33, %v3204_v7  ;;  %v1625_v33 = vld [vmem:[#allocation4 + $0x50] sm:$0xff] }
 0x5ac   :  { %2902 = vtanh.f32 %v1124_v34  ;;  %v1626_v34 = vld [vmem:[#allocation4 + $0x58] sm:$0xff] }
 0x5ad   :  { %2904 = vrcp.f32 %v1119_v35  ;;  %v2811_v35 = vpack.c.bf16 %v1626_v34, %v1625_v33 }
 0x5b6   :  { %v2903_v1 = vpop.eup %2902 }
 0x5b7   :  { %v1126_v38 = vsub.f32 %v966_v15, %v2903_v1  ;;  %v2905_v40 = vpop.eup %2904 }
 0x5b9   :  { %v1127_v42 = vmul.f32 %v2905_v40, %v1126_v38  ;;  %v1628_v38 = vld [vmem:[#allocation4 + $0x68] sm:$0xff] }
 0x5bb   :  { %v1128_v44 = vadd.f32 %v2903_v1, %v1127_v42  ;;  %v1627_v1 = vld [vmem:[#allocation4 + $0x60] sm:$0xff]  ;;  %v1629_v42 = vld [vmem:[#allocation4 + $0x70] sm:$0xff] }
 0x5bc   :  { %v2814_v40 = vpack.c.bf16 %v1628_v38, %v1627_v1 }
 0x5bd   :  { %1194 = vmatmul.mubr.f32.vlgmr.msra.gmra.mrb[10].mxu0 %v1128_v44  ;;  %2221 = vmatmul.mubr.f32.vlgmr.msra.gmra.mrb[16].mxu1 %v1128_v44 }
 0x5be   :  { %2686 = vmatpush1.bf16.msra.mxu0 %v3114_v45  ;;  %2717 = vmatpush3.bf16.msra.mxu1 %v3118_v48 }
 0x5bf   :  { %2688 = vmatprep.subr.bf16.mxu0 %v3122_v51  ;;  %2718 = vmatprep.subr.bf16.mxu1 %v2998_v47 }
 0x5c0   :  { %1355 = vmatprep.mubr.f32.mxu0 %v2996_v37  ;;  %2255 = vmatprep.mubr.msk.f32.mxu1 %vm2999_vm0, %v2996_v37 }
 0x5c2   :  { %2690 = vmatpush1.bf16.msra.mxu0 %v3124_v55  ;;  %2720 = vmatpush3.bf16.msra.mxu1 %v3128_v57 }
 0x5c3   :  { %2692 = vmatprep.subr.bf16.mxu0 %v3132_v60  ;;  %2721 = vmatprep.subr.bf16.mxu1 %v2998_v47 }
 0x5c6   :  { %2694 = vmatpush1.bf16.msra.mxu0 %v3134_v0  ;;  %2723 = vmatpush3.bf16.msra.mxu1 %v3138_v2 }
 0x5c7   :  { %2696 = vmatprep.subr.bf16.mxu0 %v3142_v5  ;;  %2724 = vmatprep.subr.bf16.mxu1 %v2998_v47 }
 0x5ca   :  { %2698 = vmatpush1.bf16.msra.mxu0 %v3144_v9  ;;  %2726 = vmatpush3.bf16.msra.mxu1 %v3148_v11 }
 0x5cb   :  { %2700 = vmatprep.subr.bf16.mxu0 %v3152_v14  ;;  %2727 = vmatprep.subr.bf16.mxu1 %v2998_v47 }
 0x5ce   :  { %2702 = vmatpush1.bf16.msra.mxu0 %v3154_v18  ;;  %2729 = vmatpush3.bf16.msra.mxu1 %v3158_v20 }
 0x5cf   :  { %2704 = vmatprep.subr.bf16.mxu0 %v3162_v23  ;;  %2730 = vmatprep.subr.bf16.mxu1 %v2998_v47 }
 0x5d2   :  { %2706 = vmatpush1.bf16.msra.mxu0 %v3164_v27  ;;  %2732 = vmatpush3.bf16.msra.mxu1 %v3168_v29 }
 0x5d3   :  { %2708 = vmatprep.subr.bf16.mxu0 %v3172_v32  ;;  %2733 = vmatprep.subr.bf16.mxu1 %v2998_v47 }
 0x5d6   :  { %2710 = vmatpush1.bf16.msra.mxu0 %v3174_v36  ;;  %2735 = vmatpush3.bf16.msra.mxu1 %v3178_v39 }
 0x5d7   :  { %2712 = vmatprep.subr.bf16.mxu0 %v3182_v43  ;;  %2736 = vmatprep.subr.bf16.mxu1 %v2998_v47 }
 0x5da   :  { %2714 = vmatpush1.bf16.msra.mxu0 %v3184_v50  ;;  %2738 = vmatpush3.bf16.msra.mxu1 %v3188_v53 }
 0x5db   :  { %2740 = vmatprep.subr.bf16.mxu0 %v3112_v41  ;;  %2771 = vmatprep.subr.bf16.mxu1 %v2998_v47 }
 0x690   :  { %v1195_v7 = vpop.f32.mrb[10].mxu0  ;;  %v1266_v46 = vpop.f32.mrb[16].mxu1 }
 0x691   :  { %v1832_v49 = vmul.f32 -1.442695, %v1195_v7  ;;  %v1197_v52 = vpop.f32.mrb[11].mxu0  ;;  %v2222_v54 = vpop.f32.mrb[17].mxu1  ;;  %v1284_v59 = vadd.f32 %v1266_v46, %v3206_v10  ;;  %v1631_v46 = vld [vmem:[#allocation4 + $0x80] sm:$0xff] }
 0x692   :  { %v1833_v56 = vmul.f32 -1.442695, %v1197_v52 }
 0x693   :  { %2906 = vpow2.f32 %v1832_v49  ;;  %v1632_v49 = vld [vmem:[#allocation4 + $0x88] sm:$0xff] }
 0x694   :  { %2908 = vpow2.f32 %v1833_v56  ;;  %v2820_v52 = vpack.c.bf16 %v1632_v49, %v1631_v46 }
 0x69d   :  { %v2907_v58 = vpop.eup %2906 }
 0x69e   :  { %v1274_v61 = vadd.f32 1.0, %v2907_v58  ;;  %v2909_v62 = vpop.eup %2908 }
 0x69f   :  { %v1281_v8 = vadd.f32 1.0, %v2909_v62 }
 0x6a0   :  { %2910 = vrcp.f32 %v1274_v61 }
 0x6aa   :  { %v2911_v3 = vpop.eup %2910 }
 0x6ab   :  { %v1285_v4 = vmul.f32 %v2911_v3, %v1284_v59 }
 0x6ad   :  { %v1286_v41 = vadd.f32 %v3202_v6, %v1285_v4  ;;  %v1618_v6 = vld [vmem:[#allocation4 + $0x18] sm:$0xff] }
 0x6af   :  { %2912 = vtanh.f32 %v1286_v41 }
 0x6b0   :  { %2914 = vrcp.f32 %v1281_v8 }
 0x6b9   :  { %v2913_v13 = vpop.eup %2912 }
 0x6ba   :  { %v1288_v15 = vsub.f32 %v1128_v44, %v2913_v13  ;;  %v2915_v63 = vpop.eup %2914  ;;  %v1630_v44 = vld [vmem:[#allocation4 + $0x78] sm:$0xff] }
 0x6bb   :  { %v2817_v7 = vpack.c.bf16 %v1630_v44, %v1629_v42 }
 0x6bc   :  { %v1289_v17 = vmul.f32 %v2915_v63, %v1288_v15 }
 0x6be   :  { %v1290_v19 = vadd.f32 %v2913_v13, %v1289_v17 }
 0x6c0   :  { %1356 = vmatmul.mubr.f32.vlgmr.msra.gmra.mrb[12].mxu0 %v1290_v19  ;;  %2256 = vmatmul.mubr.f32.vlgmr.msra.gmra.mrb[18].mxu1 %v1290_v19 }
 0x6c1   :  { %2742 = vmatpush1.bf16.msra.mxu0 %v3114_v45  ;;  %2773 = vmatpush3.bf16.msra.mxu1 %v3118_v48 }
 0x6c2   :  { %2744 = vmatprep.subr.bf16.mxu0 %v3122_v51  ;;  %2774 = vmatprep.subr.bf16.mxu1 %v2998_v47 }
 0x6c3   :  { %1517 = vmatprep.mubr.f32.mxu0 %v2996_v37  ;;  %2290 = vmatprep.mubr.msk.f32.mxu1 %vm2999_vm0, %v2996_v37 }
 0x6c5   :  { %2746 = vmatpush1.bf16.msra.mxu0 %v3124_v55  ;;  %2776 = vmatpush3.bf16.msra.mxu1 %v3128_v57 }
 0x6c6   :  { %2748 = vmatprep.subr.bf16.mxu0 %v3132_v60  ;;  %2777 = vmatprep.subr.bf16.mxu1 %v2998_v47 }
 0x6c9   :  { %2750 = vmatpush1.bf16.msra.mxu0 %v3134_v0  ;;  %2779 = vmatpush3.bf16.msra.mxu1 %v3138_v2 }
 0x6ca   :  { %2752 = vmatprep.subr.bf16.mxu0 %v3142_v5  ;;  %2780 = vmatprep.subr.bf16.mxu1 %v2998_v47 }
 0x6cd   :  { %2754 = vmatpush1.bf16.msra.mxu0 %v3144_v9  ;;  %2782 = vmatpush3.bf16.msra.mxu1 %v3148_v11 }
 0x6ce   :  { %2756 = vmatprep.subr.bf16.mxu0 %v3152_v14  ;;  %2783 = vmatprep.subr.bf16.mxu1 %v2998_v47 }
 0x6d1   :  { %2758 = vmatpush1.bf16.msra.mxu0 %v3154_v18  ;;  %2785 = vmatpush3.bf16.msra.mxu1 %v3158_v20 }
 0x6d2   :  { %2760 = vmatprep.subr.bf16.mxu0 %v3162_v23  ;;  %2786 = vmatprep.subr.bf16.mxu1 %v2998_v47 }
 0x6d5   :  { %2762 = vmatpush1.bf16.msra.mxu0 %v3164_v27  ;;  %2788 = vmatpush3.bf16.msra.mxu1 %v3168_v29 }
 0x6d6   :  { %2764 = vmatprep.subr.bf16.mxu0 %v3172_v32  ;;  %2789 = vmatprep.subr.bf16.mxu1 %v2998_v47 }
 0x6d9   :  { %2766 = vmatpush1.bf16.msra.mxu0 %v3174_v36  ;;  %2791 = vmatpush3.bf16.msra.mxu1 %v3178_v39  ;;  %v1615_v39 = vld [vmem:[#allocation4] sm:$0xff] }
 0x6da   :  { %2768 = vmatprep.subr.bf16.mxu0 %v3182_v43  ;;  %2792 = vmatprep.subr.bf16.mxu1 %v2998_v47  ;;  %v1616_v43 = vld [vmem:[#allocation4 + $0x8] sm:$0xff] }
 0x6dd   :  { %2770 = vmatpush1.bf16.msra.mxu0 %v3184_v50  ;;  %2794 = vmatpush3.bf16.msra.mxu1 %v3188_v53  ;;  %v2796_v50 = vpack.c.bf16 %v1616_v43, %v1615_v39  ;;  %v1617_v53 = vld [vmem:[#allocation4 + $0x10] sm:$0xff] }
 0x6de   :  { %2795 = vmatprep.subr.bf16.mxu0 %v2998_v47  ;;  %2819 = vmatprep.subr.bf16.mxu1 %v2998_v47 }
 0x793   :  { %v1357_v45 = vpop.f32.mrb[12].mxu0  ;;  %v1428_v48 = vpop.f32.mrb[18].mxu1 }
 0x794   :  { %v1834_v51 = vmul.f32 -1.442695, %v1357_v45  ;;  %v1359_v55 = vpop.f32.mrb[13].mxu0  ;;  %v2257_v57 = vpop.f32.mrb[19].mxu1  ;;  %v1446_v9 = vadd.f32 %v1428_v48, %v3206_v10 }
 0x795   :  { %v1835_v60 = vmul.f32 -1.442695, %v1359_v55  ;;  %v1633_v55 = vld [vmem:[#allocation4 + $0x90] sm:$0xff]  ;;  %v1634_v57 = vld [vmem:[#allocation4 + $0x98] sm:$0xff] }
 0x796   :  { %2916 = vpow2.f32 %v1834_v51 }
 0x797   :  { %2918 = vpow2.f32 %v1835_v60  ;;  %v2823_v60 = vpack.c.bf16 %v1634_v57, %v1633_v55 }
 0x7a0   :  { %v2917_v0 = vpop.eup %2916 }
 0x7a1   :  { %v1436_v2 = vadd.f32 1.0, %v2917_v0  ;;  %v2919_v5 = vpop.eup %2918  ;;  %v1635_v0 = vld [vmem:[#allocation4 + $0xa8] sm:$0xff] }
 0x7a2   :  { %v1443_v20 = vadd.f32 1.0, %v2919_v5 }
 0x7a3   :  { %2920 = vrcp.f32 %v1436_v2 }
 0x7ad   :  { %v2921_v11 = vpop.eup %2920 }
 0x7ae   :  { %v1447_v14 = vmul.f32 %v2921_v11, %v1446_v9  ;;  %v1636_v9 = vld [vmem:[#allocation4 + $0xb0] sm:$0xff] }
 0x7b0   :  { %v1448_v18 = vadd.f32 %v1447_v14, %v3210_v16  ;;  %v2799_v16 = vpack.c.bf16 %v1618_v6, %v1617_v53 }
 0x7b2   :  { %2922 = vtanh.f32 %v1448_v18 }
 0x7b3   :  { %2924 = vrcp.f32 %v1443_v20 }
 0x7bc   :  { %v2923_v23 = vpop.eup %2922 }
 0x7bd   :  { %v1450_v27 = vsub.f32 %v1290_v19, %v2923_v23  ;;  %v2925_v29 = vpop.eup %2924 }
 0x7bf   :  { %v1451_v32 = vmul.f32 %v2925_v29, %v1450_v27 }
 0x7c1   :  { %v3435_v36 = vadd.f32 %v2923_v23, %v1451_v32 }
 0x7c3   :  { %1518 = vmatmul.mubr.f32.vlgmr.msra.gmra.mrb[14].mxu0 %v3435_v36  ;;  %2291 = vmatmul.mubr.f32.vlgmr.msra.gmra.mrb[20].mxu1 %v3435_v36 }
 0x7c4   :  { %2325 = vmatprep.mubr.msk.f32.mxu0 %vm2999_vm0, %v2996_v37  ;;  %2336 = vmatprep.mubr.msk.f32.mxu1 %vm2999_vm0, %v2996_v37  ;;  %v1622_v37 = vld [vmem:[#allocation4 + $0x38] sm:$0xff] }
 0x7c5   :  { %2797 = vmatpush3.bf16.msra.mxu0 %v2796_v50  ;;  %v2805_v26 = vpack.c.bf16 %v1622_v37, %v1621_v25  ;;  %2821 = vmatpush3.bf16.msra.mxu1 %v2820_v52 }
 0x7c6   :  { %2798 = vmatprep.subr.bf16.mxu0 %v2998_v47  ;;  %2822 = vmatprep.subr.bf16.mxu1 %v2998_v47 }
 0x7c9   :  { %2800 = vmatpush3.bf16.msra.mxu0 %v2799_v16  ;;  %2824 = vmatpush3.bf16.msra.mxu1 %v2823_v60 }
 0x7ca   :  { %2801 = vmatprep.subr.bf16.mxu0 %v2998_v47 }
 0x7cd   :  { %2803 = vmatpush3.bf16.msra.mxu0 %v2802_v24 }
 0x7ce   :  { %2804 = vmatprep.subr.bf16.mxu0 %v2998_v47 }
 0x7d1   :  { %2806 = vmatpush3.bf16.msra.mxu0 %v2805_v26 }
 0x7d2   :  { %2807 = vmatprep.subr.bf16.mxu0 %v2998_v47 }
 0x7d5   :  { %2809 = vmatpush3.bf16.msra.mxu0 %v2808_v31 }
 0x7d6   :  { %2810 = vmatprep.subr.bf16.mxu0 %v2998_v47 }
 0x7d9   :  { %2812 = vmatpush3.bf16.msra.mxu0 %v2811_v35 }
 0x7da   :  { %2813 = vmatprep.subr.bf16.mxu0 %v2998_v47 }
 0x7dd   :  { %2815 = vmatpush3.bf16.msra.mxu0 %v2814_v40 }
 0x7de   :  { %2816 = vmatprep.subr.bf16.mxu0 %v2998_v47 }
 0x7e1   :  { %2818 = vmatpush3.bf16.msra.mxu0 %v2817_v7 }
 0x896   :  { %v1519_v54 = vpop.f32.mrb[14].mxu0  ;;  %v1590_v56 = vpop.f32.mrb[20].mxu1 }
 0x897   :  { %v1836_v58 = vmul.f32 -1.442695, %v1519_v54  ;;  %v1521_v61 = vpop.f32.mrb[15].mxu0  ;;  %v2292_v62 = vpop.f32.mrb[21].mxu1  ;;  %v1608_v8 = vadd.f32 %v1590_v56, %v3206_v10 }
 0x898   :  { %v1837_v59 = vmul.f32 -1.442695, %v1521_v61 }
 0x899   :  { %2926 = vpow2.f32 %v1836_v58 }
 0x89a   :  { %2928 = vpow2.f32 %v1837_v59 }
 0x8a3   :  { %v2927_v3 = vpop.eup %2926 }
 0x8a4   :  { %v1598_v4 = vadd.f32 1.0, %v2927_v3  ;;  %v2929_v41 = vpop.eup %2928 }
 0x8a5   :  { %v1605_v17 = vadd.f32 1.0, %v2929_v41 }
 0x8a6   :  { %2930 = vrcp.f32 %v1598_v4 }
 0x8b0   :  { %v2931_v13 = vpop.eup %2930 }
 0x8b1   :  { %v1609_v15 = vmul.f32 %v2931_v13, %v1608_v8 }
 0x8b3   :  { %v1610_v63 = vadd.f32 %v3208_v12, %v1609_v15 }
 0x8b5   :  { %2932 = vtanh.f32 %v1610_v63 }
 0x8b6   :  { %2934 = vrcp.f32 %v1605_v17 }
 0x8bf   :  { %v2933_v47 = vpop.eup %2932 }
 0x8c0   :  { %v1612_v19 = vsub.f32 %v3435_v36, %v2933_v47  ;;  %v2935_v45 = vpop.eup %2934 }
 0x8c2   :  { %v1613_v48 = vmul.f32 %v2935_v45, %v1612_v19 }
 0x8c4   :  { %v1614_v51 = vadd.f32 %v2933_v47, %v1613_v48 }
 0x8c6   :  { %2326 = vmatmul.mubr.f32.vlgmr.msra.gmra.mrb[16].mxu0 %v1614_v51 }
 0x999   :  { %v1703_v10 = vpop.f32.mrb[16].mxu0 }
 0x99a   :  { %v1704_v2 = vadd.f32 %v1703_v10, %v1635_v0  ;;  %v2327_v5 = vpop.f32.mrb[17].mxu0 }
 0x99c   :  { %v1707_v12 = vmax.f32 %v1704_v2, 0.0 }
 0x99e   :  { %2337 = vmatmul.mubr.msk.f32.vlgmr.msra.gmra.mrb[22].mxu1 %vm1708_vm3, %v1707_v12 }
 0xa71   :  { %v1778_v11 = vpop.f32.mrb[22].mxu1 }
 0xa72   :  { %v1779_v14 = vadd.f32 %v1778_v11, %v1636_v9  ;;  %v2338_v18 = vpop.f32.mrb[23].mxu1 }
 0xa74   :  { %1782 = vmax.xlane.f32.xlu1 %v1779_v14 }
 0xb01   :  { %v1783_v20 = vpop.xlane.xlu1 %1782 }
 0xb02   :  { %v1784_v23 = vsub.f32 %v1779_v14, %v1783_v20 }
 0xb04   :  { %v1785_v27 = vmul.f32 1.442695, %v1784_v23 }
 0xb06   :  { %2936 = vpow2.f32 %v1785_v27 }
 0xb10   :  { %v2937_v29 = vpop.eup %2936 }
 0xb11   :  { %1787 = vadd.xlane.f32.xlu0 %v2937_v29 }
 0xb9e   :  { %v1788_v32 = vpop.xlane.xlu0 %1787 }
 0xb9f   :  { %2938 = vrcp.f32 %v1788_v32 }
 0xba9   :  { %v2939_v36 = vpop.eup %2938 }
 0xbaa   :  { %v1790_v39 = vmul.f32 %v2939_v36, %v2937_v29 }
 0xbac   :  { %1791 = vst [vmem:[%s3460_s3] sm:$0xff] %v1790_v39 }
 0xbad   :  { %1796 = vsyncpa [#allocation3], 1 }
 0xbae   :  { %1797 = vsyncpa [#allocation5], 1 }

</bundles_post_ra>
